<compile_context>
chip_gen: v7x
topology: tpu7x:2x2x1
jax: 0.10.0
libtpu: 0.0.40
codegen_flags: <defaults>
</compile_context>

<pallas_src>
import jax
import jax.numpy as jnp
from jax.experimental import pallas as pl
from jax.experimental.pallas import tpu as pltpu

IN_CHANNELS = 3
NUM_CLASSES = 10
IMG = 32


# --------------------------- kernel helpers ---------------------------------
def _conv_relu(a, wside, w_ref, b_ref, patch_ref):
    """Valid 3x3 conv + bias + ReLU on a flat (C_in, H*W) activation row.

    a        : (C_in, n) row-major flattening of (H, W), with W == wside.
    w_ref    : (C_out, 9*C_in), k ordered as (ky*3 + kx)*C_in + c_in.
    b_ref    : (C_out, 1).
    patch_ref: VMEM scratch used to assemble the im2col patch matrix.
    Returns (C_out, n_out) with n_out = n - 2*wside - 2; column p = y*W + x is
    the true conv output whenever x <= W-3 (other columns are unused, finite
    garbage that the later selection matmul multiplies by 0).
    """
    cin, n = a.shape
    n_out = n - (2 * wside + 2)
    for ky in range(3):
        for kx in range(3):
            shift = ky * wside + kx
            row0 = (ky * 3 + kx) * cin
            patch_ref[row0:row0 + cin, :n_out] = a[:, shift:shift + n_out]
    patches = patch_ref[:9 * cin, :n_out]                     # (9*C_in, n_out)
    y = jnp.dot(w_ref[...], patches, preferred_element_type=jnp.float32)
    return jnp.maximum(y + b_ref[...], 0.0)


def _maxpool_taps(r, wside):
    """Elementwise max of the 4 pool taps (0, 1, W, W+1) of a flat conv output."""
    n_conv = r.shape[1]
    n_pool = n_conv - (wside + 1)
    return jnp.maximum(
        jnp.maximum(r[:, 0:n_pool], r[:, 1:n_pool + 1]),
        jnp.maximum(r[:, wside:wside + n_pool],
                    r[:, wside + 1:wside + 1 + n_pool]))


def lenet_kernel(x_ref, w1_ref, b1_ref, s1_ref, w2_ref, b2_ref, s2_ref,
                 w3_ref, b3_ref, wfc_ref, bfc_ref, o_ref, patch_ref):
    x = x_ref[0]                                              # (3, 1024): 32x32 flat

    # stage 1: conv1 3->5 (32x32 -> 30x30), pool -> 15x15
    r1 = _conv_relu(x, 32, w1_ref, b1_ref, patch_ref)         # (5, 958)
    p1 = jnp.dot(_maxpool_taps(r1, 32), s1_ref[...],
                 preferred_element_type=jnp.float32)          # (5, 225)

    # stage 2: conv2 5->10 (15x15 -> 13x13), pool -> 6x6
    r2 = _conv_relu(p1, 15, w2_ref, b2_ref, patch_ref)        # (10, 193)
    p2 = jnp.dot(_maxpool_taps(r2, 15), s2_ref[...],
                 preferred_element_type=jnp.float32)          # (10, 36)

    # stage 3: conv3 10->10 (6x6 -> 4x4), pool -> 2x2
    r3 = _conv_relu(p2, 6, w3_ref, b3_ref, patch_ref)         # (10, 22)
    m3 = _maxpool_taps(r3, 6)                                 # (10, 15)

    # TODO(synk): nn.Dropout(0.5) is modeled in eval / toggle-off mode (identity).

    # fc1 over the flattened (10, 2, 2) pooled activations.  In the 6-wide flat
    # layout the pooled positions (i, j) sit at columns 2*i*6 + 2*j, i.e.
    # {0, 2, 12, 14}, in torch-flatten order q = i*2 + j.
    z = bfc_ref[...]                                          # (10, 1)
    for q, col in enumerate((0, 2, 12, 14)):
        z = z + jnp.dot(wfc_ref[q], m3[:, col:col + 1],
                        preferred_element_type=jnp.float32)

    # log_softmax over the 10 classes (sublane axis of the (10, 1) column)
    zmax = jnp.max(z, axis=0, keepdims=True)
    ez = jnp.exp(z - zmax)
    lse = zmax + jnp.log(jnp.sum(ez, axis=0, keepdims=True))
    o_ref[0] = (z - lse).astype(o_ref.dtype)


# --------------------------- wrapper -----------------------------------------
def modified_lenet_forward(x_nchw, kparams):
    """x_nchw: (N, 3, 32, 32) float32 -> (N, 10) log-probabilities."""
    w1, b1, s1, w2, b2, s2, w3, b3, wfc, bfc = kparams
    n, c, h, w = x_nchw.shape
    x_flat = x_nchw.reshape(n, c, h * w).astype(jnp.float32)  # free: metadata only

    def full_spec(shape):
        return pl.BlockSpec(shape, lambda i: (0,) * len(shape))

    params = (w1, b1, s1, w2, b2, s2, w3, b3, wfc, bfc)
    out = pl.pallas_call(
        lenet_kernel,
        out_shape=jax.ShapeDtypeStruct((n, NUM_CLASSES, 1), jnp.float32),
        grid=(n,),
        in_specs=[pl.BlockSpec((1, c, h * w), lambda i: (i, 0, 0))]
                 + [full_spec(p.shape) for p in params],
        out_specs=pl.BlockSpec((1, NUM_CLASSES, 1), lambda i: (i, 0, 0)),
        scratch_shapes=[pltpu.VMEM((96, 1024), jnp.float32)],   # im2col patches
        compiler_params=pltpu.CompilerParams(
            dimension_semantics=("parallel",),
            vmem_limit_bytes=32 * 1024 * 1024),
    )(x_flat, *params)
    return out.reshape(n, NUM_CLASSES)


# --------------------------- parameter handling ------------------------------
def init_params(key):
    """PyTorch-layout parameters with PyTorch-like uniform init."""
    ks = jax.random.split(key, 8)

    def conv_init(kw, kb, cout, cin):
        bound = 1.0 / (cin * 9) ** 0.5
        w = jax.random.uniform(kw, (cout, cin, 3, 3), jnp.float32, -bound, bound)
        b = jax.random.uniform(kb, (cout,), jnp.float32, -bound, bound)
        return w, b

    w1, b1 = conv_init(ks[0], ks[1], 5, IN_CHANNELS)
    w2, b2 = conv_init(ks[2], ks[3], 10, 5)
    w3, b3 = conv_init(ks[4], ks[5], 10, 10)
    bound = 1.0 / (10 * 2 * 2) ** 0.5
    wf = jax.random.uniform(ks[6], (NUM_CLASSES, 40), jnp.float32, -bound, bound)
    bf = jax.random.uniform(ks[7], (NUM_CLASSES,), jnp.float32, -bound, bound)
    return (w1, b1, w2, b2, w3, b3, wf, bf)


def _pool_select(wside):
    """0/1 matrix mapping the flat max-of-4-taps row to the pooled, compacted row."""
    wp = (wside - 2) // 2
    n_pool = wside * wside - (3 * wside + 3)
    q = jnp.arange(wp * wp)
    rows = 2 * (q // wp) * wside + 2 * (q % wp)
    return jnp.zeros((n_pool, wp * wp), jnp.float32).at[rows, q].set(1.0)


def prepare_kernel_params(params):
    w1, b1, w2, b2, w3, b3, wf, bf = params

    def conv_w(w):  # OIHW -> (C_out, 9*C_in) with k = (ky*3+kx)*C_in + c_in
        cout, cin = w.shape[0], w.shape[1]
        return jnp.transpose(w, (0, 2, 3, 1)).reshape(cout, 9 * cin)

    def col(b):
        return b.reshape(-1, 1)

    s1 = _pool_select(32)                                   # (925, 225)
    s2 = _pool_select(15)                                   # (177, 36)
    # fc1 weight (10, 40) -> (4, 10, 10): wfc[q, o, c] = wf[o, c*4 + q]
    wfc = jnp.transpose(wf.reshape(NUM_CLASSES, 10, 4), (2, 0, 1))
    return (conv_w(w1), col(b1), s1, conv_w(w2), col(b2), s2,
            conv_w(w3), col(b3), wfc, col(bf))


# --------------------------- plain-JAX reference -----------------------------
def reference(x_nchw, params):
    w1, b1, w2, b2, w3, b3, wf, bf = params
    hp = jax.lax.Precision.HIGHEST

    def block(x, w, b):
        y = jax.lax.conv_general_dilated(
            x, w, window_strides=(1, 1), padding='VALID',
            dimension_numbers=('NCHW', 'OIHW', 'NCHW'), precision=hp)
        y = jnp.maximum(y + b[None, :, None, None], 0.0)
        return jax.lax.reduce_window(y, -jnp.inf, jax.lax.max,
                                     (1, 1, 2, 2), (1, 1, 2, 2), 'VALID')

    x = block(x_nchw, w1, b1)
    x = block(x, w2, b2)
    x = block(x, w3, b3)
    flat = x.reshape(x.shape[0], -1)                          # torch.flatten(x, 1)
    z = jnp.dot(flat, wf.T, precision=hp) + bf
    return jax.nn.log_softmax(z, axis=-1)


# --------------------------- main ---------------------------------------------
if __name__ == "__main__":
    key = jax.random.PRNGKey(0)
    kx, kp = jax.random.split(key)

    N = 2
    x = jax.random.normal(kx, (N, IN_CHANNELS, IMG, IMG), jnp.float32)

    torch_params = init_params(kp)
    kernel_params = prepare_kernel_params(torch_params)

    out = modified_lenet_forward(x, kernel_params)
    out = jax.block_until_ready(out)

    ref = reference(x, torch_params)
    assert out.shape == (N, NUM_CLASSES)
    err = jnp.max(jnp.abs(out - ref))
    assert jnp.allclose(out, ref, rtol=1e-3, atol=1e-3), f"max abs err {err}"

    # TODO(synk): BaseNN.get_flat_params / load_from_flat_params are host-side
    # parameter plumbing and are not part of the forward pass.
    print("KERNEL_OK")
</pallas_src>

<mosaic_0001>
module attributes {stable_mosaic.version = 11 : i64} {
  func.func @lenet_kernel(%arg0: i32, %arg1: memref<1x3x1024xf32, #tpu.memory_space<vmem>>, %arg2: memref<5x27xf32, #tpu.memory_space<vmem>>, %arg3: memref<5x1xf32, #tpu.memory_space<vmem>>, %arg4: memref<925x225xf32, #tpu.memory_space<vmem>>, %arg5: memref<10x45xf32, #tpu.memory_space<vmem>>, %arg6: memref<10x1xf32, #tpu.memory_space<vmem>>, %arg7: memref<177x36xf32, #tpu.memory_space<vmem>>, %arg8: memref<10x90xf32, #tpu.memory_space<vmem>>, %arg9: memref<10x1xf32, #tpu.memory_space<vmem>>, %arg10: memref<4x10x10xf32, #tpu.memory_space<vmem>>, %arg11: memref<10x1xf32, #tpu.memory_space<vmem>>, %arg12: memref<1x10x1xf32, #tpu.memory_space<vmem>>, %arg13: memref<96x1024xf32, #tpu.memory_space<vmem>>) attributes {dimension_semantics = [#tpu.dimension_semantics<parallel>], iteration_bounds = array<i64: 2>, scalar_prefetch = 0 : i64, scratch_operands = 1 : i64, tpu.core_type = #tpu.core_type<tc>, window_params = [{transform_indices = @transform_0, window_bounds = array<i64: 1, 3, 1024>}, {pipeline_mode = #tpu.pipeline_mode<synchronous>, transform_indices = @transform_1, window_bounds = array<i64: 5, 27>}, {pipeline_mode = #tpu.pipeline_mode<synchronous>, transform_indices = @transform_2, window_bounds = array<i64: 5, 1>}, {pipeline_mode = #tpu.pipeline_mode<synchronous>, transform_indices = @transform_3, window_bounds = array<i64: 925, 225>}, {pipeline_mode = #tpu.pipeline_mode<synchronous>, transform_indices = @transform_4, window_bounds = array<i64: 10, 45>}, {pipeline_mode = #tpu.pipeline_mode<synchronous>, transform_indices = @transform_5, window_bounds = array<i64: 10, 1>}, {pipeline_mode = #tpu.pipeline_mode<synchronous>, transform_indices = @transform_6, window_bounds = array<i64: 177, 36>}, {pipeline_mode = #tpu.pipeline_mode<synchronous>, transform_indices = @transform_7, window_bounds = array<i64: 10, 90>}, {pipeline_mode = #tpu.pipeline_mode<synchronous>, transform_indices = @transform_8, window_bounds = array<i64: 10, 1>}, {pipeline_mode = #tpu.pipeline_mode<synchronous>, transform_indices = @transform_9, window_bounds = array<i64: 4, 10, 10>}, {pipeline_mode = #tpu.pipeline_mode<synchronous>, transform_indices = @transform_10, window_bounds = array<i64: 10, 1>}, {transform_indices = @transform_11, window_bounds = array<i64: 1, 10, 1>}]} {
    %c0 = arith.constant 0 : index
    %c0_0 = arith.constant 0 : index
    %c0_1 = arith.constant 0 : index
    %0 = vector.load %arg1[%c0, %c0_0, %c0_1] : memref<1x3x1024xf32, #tpu.memory_space<vmem>>, vector<1x3x1024xf32>
    %1 = vector.shape_cast %0 : vector<1x3x1024xf32> to vector<3x1024xf32>
    %2 = vector.extract_strided_slice %1 {offsets = [0, 0], sizes = [3, 958], strides = [1, 1]} : vector<3x1024xf32> to vector<3x958xf32>
    %c0_2 = arith.constant 0 : index
    %c0_3 = arith.constant 0 : index
    %3 = vector.load %arg13[%c0_2, %c0_3] : memref<96x1024xf32, #tpu.memory_space<vmem>>, vector<3x958xf32>
    tpu.vector_store %arg13[%c0_2, %c0_3], %2 {strides = array<i32>} : memref<96x1024xf32, #tpu.memory_space<vmem>>, vector<3x958xf32>,
    %4 = vector.extract_strided_slice %1 {offsets = [0, 1], sizes = [3, 958], strides = [1, 1]} : vector<3x1024xf32> to vector<3x958xf32>
    %c3 = arith.constant 3 : index
    %c0_4 = arith.constant 0 : index
    %5 = vector.load %arg13[%c3, %c0_4] : memref<96x1024xf32, #tpu.memory_space<vmem>>, vector<3x958xf32>
    tpu.vector_store %arg13[%c3, %c0_4], %4 {strides = array<i32>} : memref<96x1024xf32, #tpu.memory_space<vmem>>, vector<3x958xf32>,
    %6 = vector.extract_strided_slice %1 {offsets = [0, 2], sizes = [3, 958], strides = [1, 1]} : vector<3x1024xf32> to vector<3x958xf32>
    %c6 = arith.constant 6 : index
    %c0_5 = arith.constant 0 : index
    %7 = vector.load %arg13[%c6, %c0_5] : memref<96x1024xf32, #tpu.memory_space<vmem>>, vector<3x958xf32>
    tpu.vector_store %arg13[%c6, %c0_5], %6 {strides = array<i32>} : memref<96x1024xf32, #tpu.memory_space<vmem>>, vector<3x958xf32>,
    %8 = vector.extract_strided_slice %1 {offsets = [0, 32], sizes = [3, 958], strides = [1, 1]} : vector<3x1024xf32> to vector<3x958xf32>
    %c9 = arith.constant 9 : index
    %c0_6 = arith.constant 0 : index
    %9 = vector.load %arg13[%c9, %c0_6] : memref<96x1024xf32, #tpu.memory_space<vmem>>, vector<3x958xf32>
    tpu.vector_store %arg13[%c9, %c0_6], %8 {strides = array<i32>} : memref<96x1024xf32, #tpu.memory_space<vmem>>, vector<3x958xf32>,
    %10 = vector.extract_strided_slice %1 {offsets = [0, 33], sizes = [3, 958], strides = [1, 1]} : vector<3x1024xf32> to vector<3x958xf32>
    %c12 = arith.constant 12 : index
    %c0_7 = arith.constant 0 : index
    %11 = vector.load %arg13[%c12, %c0_7] : memref<96x1024xf32, #tpu.memory_space<vmem>>, vector<3x958xf32>
    tpu.vector_store %arg13[%c12, %c0_7], %10 {strides = array<i32>} : memref<96x1024xf32, #tpu.memory_space<vmem>>, vector<3x958xf32>,
    %12 = vector.extract_strided_slice %1 {offsets = [0, 34], sizes = [3, 958], strides = [1, 1]} : vector<3x1024xf32> to vector<3x958xf32>
    %c15 = arith.constant 15 : index
    %c0_8 = arith.constant 0 : index
    %13 = vector.load %arg13[%c15, %c0_8] : memref<96x1024xf32, #tpu.memory_space<vmem>>, vector<3x958xf32>
    tpu.vector_store %arg13[%c15, %c0_8], %12 {strides = array<i32>} : memref<96x1024xf32, #tpu.memory_space<vmem>>, vector<3x958xf32>,
    %14 = vector.extract_strided_slice %1 {offsets = [0, 64], sizes = [3, 958], strides = [1, 1]} : vector<3x1024xf32> to vector<3x958xf32>
    %c18 = arith.constant 18 : index
    %c0_9 = arith.constant 0 : index
    %15 = vector.load %arg13[%c18, %c0_9] : memref<96x1024xf32, #tpu.memory_space<vmem>>, vector<3x958xf32>
    tpu.vector_store %arg13[%c18, %c0_9], %14 {strides = array<i32>} : memref<96x1024xf32, #tpu.memory_space<vmem>>, vector<3x958xf32>,
    %16 = vector.extract_strided_slice %1 {offsets = [0, 65], sizes = [3, 958], strides = [1, 1]} : vector<3x1024xf32> to vector<3x958xf32>
    %c21 = arith.constant 21 : index
    %c0_10 = arith.constant 0 : index
    %17 = vector.load %arg13[%c21, %c0_10] : memref<96x1024xf32, #tpu.memory_space<vmem>>, vector<3x958xf32>
    tpu.vector_store %arg13[%c21, %c0_10], %16 {strides = array<i32>} : memref<96x1024xf32, #tpu.memory_space<vmem>>, vector<3x958xf32>,
    %18 = vector.extract_strided_slice %1 {offsets = [0, 66], sizes = [3, 958], strides = [1, 1]} : vector<3x1024xf32> to vector<3x958xf32>
    %c24 = arith.constant 24 : index
    %c0_11 = arith.constant 0 : index
    %19 = vector.load %arg13[%c24, %c0_11] : memref<96x1024xf32, #tpu.memory_space<vmem>>, vector<3x958xf32>
    tpu.vector_store %arg13[%c24, %c0_11], %18 {strides = array<i32>} : memref<96x1024xf32, #tpu.memory_space<vmem>>, vector<3x958xf32>,
    %c0_12 = arith.constant 0 : index
    %c0_13 = arith.constant 0 : index
    %20 = vector.load %arg13[%c0_12, %c0_13] : memref<96x1024xf32, #tpu.memory_space<vmem>>, vector<27x958xf32>
    %c0_14 = arith.constant 0 : index
    %c0_15 = arith.constant 0 : index
    %21 = vector.load %arg2[%c0_14, %c0_15] : memref<5x27xf32, #tpu.memory_space<vmem>>, vector<5x27xf32>
    %cst = arith.constant dense<0.000000e+00> : vector<5x958xf32>
    %22 = tpu.matmul %21, %20, %cst {dimension_numbers = #tpu.dot_dimension_numbers<[1], [0], [0], [1], [0, 0, 1, 1], [], []>} : vector<5x27xf32>, vector<27x958xf32>, vector<5x958xf32> -> vector<5x958xf32>
    %c0_16 = arith.constant 0 : index
    %c0_17 = arith.constant 0 : index
    %23 = vector.load %arg3[%c0_16, %c0_17] : memref<5x1xf32, #tpu.memory_space<vmem>>, vector<5x1xf32>
    %24 = vector.broadcast %23 : vector<5x1xf32> to vector<5x958xf32>
    %25 = arith.addf %22, %24 : vector<5x958xf32>
    %cst_18 = arith.constant 0.000000e+00 : f32
    %26 = vector.broadcast %cst_18 : f32 to vector<5x958xf32>
    %27 = arith.maximumf %25, %26 : vector<5x958xf32>
    %28 = vector.extract_strided_slice %27 {offsets = [0, 0], sizes = [5, 925], strides = [1, 1]} : vector<5x958xf32> to vector<5x925xf32>
    %29 = vector.extract_strided_slice %27 {offsets = [0, 1], sizes = [5, 925], strides = [1, 1]} : vector<5x958xf32> to vector<5x925xf32>
    %30 = arith.maximumf %28, %29 : vector<5x925xf32>
    %31 = vector.extract_strided_slice %27 {offsets = [0, 32], sizes = [5, 925], strides = [1, 1]} : vector<5x958xf32> to vector<5x925xf32>
    %32 = vector.extract_strided_slice %27 {offsets = [0, 33], sizes = [5, 925], strides = [1, 1]} : vector<5x958xf32> to vector<5x925xf32>
    %33 = arith.maximumf %31, %32 : vector<5x925xf32>
    %34 = arith.maximumf %30, %33 : vector<5x925xf32>
    %c0_19 = arith.constant 0 : index
    %c0_20 = arith.constant 0 : index
    %35 = vector.load %arg4[%c0_19, %c0_20] : memref<925x225xf32, #tpu.memory_space<vmem>>, vector<925x225xf32>
    %cst_21 = arith.constant dense<0.000000e+00> : vector<5x225xf32>
    %36 = tpu.matmul %34, %35, %cst_21 {dimension_numbers = #tpu.dot_dimension_numbers<[1], [0], [0], [1], [0, 0, 1, 1], [], []>} : vector<5x925xf32>, vector<925x225xf32>, vector<5x225xf32> -> vector<5x225xf32>
    %37 = vector.extract_strided_slice %36 {offsets = [0, 0], sizes = [5, 193], strides = [1, 1]} : vector<5x225xf32> to vector<5x193xf32>
    %c0_22 = arith.constant 0 : index
    %c0_23 = arith.constant 0 : index
    %38 = vector.load %arg13[%c0_22, %c0_23] : memref<96x1024xf32, #tpu.memory_space<vmem>>, vector<5x193xf32>
    tpu.vector_store %arg13[%c0_22, %c0_23], %37 {strides = array<i32>} : memref<96x1024xf32, #tpu.memory_space<vmem>>, vector<5x193xf32>,
    %39 = vector.extract_strided_slice %36 {offsets = [0, 1], sizes = [5, 193], strides = [1, 1]} : vector<5x225xf32> to vector<5x193xf32>
    %c5 = arith.constant 5 : index
    %c0_24 = arith.constant 0 : index
    %40 = vector.load %arg13[%c5, %c0_24] : memref<96x1024xf32, #tpu.memory_space<vmem>>, vector<5x193xf32>
    tpu.vector_store %arg13[%c5, %c0_24], %39 {strides = array<i32>} : memref<96x1024xf32, #tpu.memory_space<vmem>>, vector<5x193xf32>,
    %41 = vector.extract_strided_slice %36 {offsets = [0, 2], sizes = [5, 193], strides = [1, 1]} : vector<5x225xf32> to vector<5x193xf32>
    %c10 = arith.constant 10 : index
    %c0_25 = arith.constant 0 : index
    %42 = vector.load %arg13[%c10, %c0_25] : memref<96x1024xf32, #tpu.memory_space<vmem>>, vector<5x193xf32>
    tpu.vector_store %arg13[%c10, %c0_25], %41 {strides = array<i32>} : memref<96x1024xf32, #tpu.memory_space<vmem>>, vector<5x193xf32>,
    %43 = vector.extract_strided_slice %36 {offsets = [0, 15], sizes = [5, 193], strides = [1, 1]} : vector<5x225xf32> to vector<5x193xf32>
    %c15_26 = arith.constant 15 : index
    %c0_27 = arith.constant 0 : index
    %44 = vector.load %arg13[%c15_26, %c0_27] : memref<96x1024xf32, #tpu.memory_space<vmem>>, vector<5x193xf32>
    tpu.vector_store %arg13[%c15_26, %c0_27], %43 {strides = array<i32>} : memref<96x1024xf32, #tpu.memory_space<vmem>>, vector<5x193xf32>,
    %45 = vector.extract_strided_slice %36 {offsets = [0, 16], sizes = [5, 193], strides = [1, 1]} : vector<5x225xf32> to vector<5x193xf32>
    %c20 = arith.constant 20 : index
    %c0_28 = arith.constant 0 : index
    %46 = vector.load %arg13[%c20, %c0_28] : memref<96x1024xf32, #tpu.memory_space<vmem>>, vector<5x193xf32>
    tpu.vector_store %arg13[%c20, %c0_28], %45 {strides = array<i32>} : memref<96x1024xf32, #tpu.memory_space<vmem>>, vector<5x193xf32>,
    %47 = vector.extract_strided_slice %36 {offsets = [0, 17], sizes = [5, 193], strides = [1, 1]} : vector<5x225xf32> to vector<5x193xf32>
    %c25 = arith.constant 25 : index
    %c0_29 = arith.constant 0 : index
    %48 = vector.load %arg13[%c25, %c0_29] : memref<96x1024xf32, #tpu.memory_space<vmem>>, vector<5x193xf32>
    tpu.vector_store %arg13[%c25, %c0_29], %47 {strides = array<i32>} : memref<96x1024xf32, #tpu.memory_space<vmem>>, vector<5x193xf32>,
    %49 = vector.extract_strided_slice %36 {offsets = [0, 30], sizes = [5, 193], strides = [1, 1]} : vector<5x225xf32> to vector<5x193xf32>
    %c30 = arith.constant 30 : index
    %c0_30 = arith.constant 0 : index
    %50 = vector.load %arg13[%c30, %c0_30] : memref<96x1024xf32, #tpu.memory_space<vmem>>, vector<5x193xf32>
    tpu.vector_store %arg13[%c30, %c0_30], %49 {strides = array<i32>} : memref<96x1024xf32, #tpu.memory_space<vmem>>, vector<5x193xf32>,
    %51 = vector.extract_strided_slice %36 {offsets = [0, 31], sizes = [5, 193], strides = [1, 1]} : vector<5x225xf32> to vector<5x193xf32>
    %c35 = arith.constant 35 : index
    %c0_31 = arith.constant 0 : index
    %52 = vector.load %arg13[%c35, %c0_31] : memref<96x1024xf32, #tpu.memory_space<vmem>>, vector<5x193xf32>
    tpu.vector_store %arg13[%c35, %c0_31], %51 {strides = array<i32>} : memref<96x1024xf32, #tpu.memory_space<vmem>>, vector<5x193xf32>,
    %53 = vector.extract_strided_slice %36 {offsets = [0, 32], sizes = [5, 193], strides = [1, 1]} : vector<5x225xf32> to vector<5x193xf32>
    %c40 = arith.constant 40 : index
    %c0_32 = arith.constant 0 : index
    %54 = vector.load %arg13[%c40, %c0_32] : memref<96x1024xf32, #tpu.memory_space<vmem>>, vector<5x193xf32>
    tpu.vector_store %arg13[%c40, %c0_32], %53 {strides = array<i32>} : memref<96x1024xf32, #tpu.memory_space<vmem>>, vector<5x193xf32>,
    %c0_33 = arith.constant 0 : index
    %c0_34 = arith.constant 0 : index
    %55 = vector.load %arg13[%c0_33, %c0_34] : memref<96x1024xf32, #tpu.memory_space<vmem>>, vector<45x193xf32>
    %c0_35 = arith.constant 0 : index
    %c0_36 = arith.constant 0 : index
    %56 = vector.load %arg5[%c0_35, %c0_36] : memref<10x45xf32, #tpu.memory_space<vmem>>, vector<10x45xf32>
    %cst_37 = arith.constant dense<0.000000e+00> : vector<10x193xf32>
    %57 = tpu.matmul %56, %55, %cst_37 {dimension_numbers = #tpu.dot_dimension_numbers<[1], [0], [0], [1], [0, 0, 1, 1], [], []>} : vector<10x45xf32>, vector<45x193xf32>, vector<10x193xf32> -> vector<10x193xf32>
    %c0_38 = arith.constant 0 : index
    %c0_39 = arith.constant 0 : index
    %58 = vector.load %arg6[%c0_38, %c0_39] : memref<10x1xf32, #tpu.memory_space<vmem>>, vector<10x1xf32>
    %59 = vector.broadcast %58 : vector<10x1xf32> to vector<10x193xf32>
    %60 = arith.addf %57, %59 : vector<10x193xf32>
    %cst_40 = arith.constant 0.000000e+00 : f32
    %61 = vector.broadcast %cst_40 : f32 to vector<10x193xf32>
    %62 = arith.maximumf %60, %61 : vector<10x193xf32>
    %63 = vector.extract_strided_slice %62 {offsets = [0, 0], sizes = [10, 177], strides = [1, 1]} : vector<10x193xf32> to vector<10x177xf32>
    %64 = vector.extract_strided_slice %62 {offsets = [0, 1], sizes = [10, 177], strides = [1, 1]} : vector<10x193xf32> to vector<10x177xf32>
    %65 = arith.maximumf %63, %64 : vector<10x177xf32>
    %66 = vector.extract_strided_slice %62 {offsets = [0, 15], sizes = [10, 177], strides = [1, 1]} : vector<10x193xf32> to vector<10x177xf32>
    %67 = vector.extract_strided_slice %62 {offsets = [0, 16], sizes = [10, 177], strides = [1, 1]} : vector<10x193xf32> to vector<10x177xf32>
    %68 = arith.maximumf %66, %67 : vector<10x177xf32>
    %69 = arith.maximumf %65, %68 : vector<10x177xf32>
    %c0_41 = arith.constant 0 : index
    %c0_42 = arith.constant 0 : index
    %70 = vector.load %arg7[%c0_41, %c0_42] : memref<177x36xf32, #tpu.memory_space<vmem>>, vector<177x36xf32>
    %cst_43 = arith.constant dense<0.000000e+00> : vector<10x36xf32>
    %71 = tpu.matmul %69, %70, %cst_43 {dimension_numbers = #tpu.dot_dimension_numbers<[1], [0], [0], [1], [0, 0, 1, 1], [], []>} : vector<10x177xf32>, vector<177x36xf32>, vector<10x36xf32> -> vector<10x36xf32>
    %72 = vector.extract_strided_slice %71 {offsets = [0, 0], sizes = [10, 22], strides = [1, 1]} : vector<10x36xf32> to vector<10x22xf32>
    %c0_44 = arith.constant 0 : index
    %c0_45 = arith.constant 0 : index
    %73 = vector.load %arg13[%c0_44, %c0_45] : memref<96x1024xf32, #tpu.memory_space<vmem>>, vector<10x22xf32>
    tpu.vector_store %arg13[%c0_44, %c0_45], %72 {strides = array<i32>} : memref<96x1024xf32, #tpu.memory_space<vmem>>, vector<10x22xf32>,
    %74 = vector.extract_strided_slice %71 {offsets = [0, 1], sizes = [10, 22], strides = [1, 1]} : vector<10x36xf32> to vector<10x22xf32>
    %c10_46 = arith.constant 10 : index
    %c0_47 = arith.constant 0 : index
    %75 = vector.load %arg13[%c10_46, %c0_47] : memref<96x1024xf32, #tpu.memory_space<vmem>>, vector<10x22xf32>
    tpu.vector_store %arg13[%c10_46, %c0_47], %74 {strides = array<i32>} : memref<96x1024xf32, #tpu.memory_space<vmem>>, vector<10x22xf32>,
    %76 = vector.extract_strided_slice %71 {offsets = [0, 2], sizes = [10, 22], strides = [1, 1]} : vector<10x36xf32> to vector<10x22xf32>
    %c20_48 = arith.constant 20 : index
    %c0_49 = arith.constant 0 : index
    %77 = vector.load %arg13[%c20_48, %c0_49] : memref<96x1024xf32, #tpu.memory_space<vmem>>, vector<10x22xf32>
    tpu.vector_store %arg13[%c20_48, %c0_49], %76 {strides = array<i32>} : memref<96x1024xf32, #tpu.memory_space<vmem>>, vector<10x22xf32>,
    %78 = vector.extract_strided_slice %71 {offsets = [0, 6], sizes = [10, 22], strides = [1, 1]} : vector<10x36xf32> to vector<10x22xf32>
    %c30_50 = arith.constant 30 : index
    %c0_51 = arith.constant 0 : index
    %79 = vector.load %arg13[%c30_50, %c0_51] : memref<96x1024xf32, #tpu.memory_space<vmem>>, vector<10x22xf32>
    tpu.vector_store %arg13[%c30_50, %c0_51], %78 {strides = array<i32>} : memref<96x1024xf32, #tpu.memory_space<vmem>>, vector<10x22xf32>,
    %80 = vector.extract_strided_slice %71 {offsets = [0, 7], sizes = [10, 22], strides = [1, 1]} : vector<10x36xf32> to vector<10x22xf32>
    %c40_52 = arith.constant 40 : index
    %c0_53 = arith.constant 0 : index
    %81 = vector.load %arg13[%c40_52, %c0_53] : memref<96x1024xf32, #tpu.memory_space<vmem>>, vector<10x22xf32>
    tpu.vector_store %arg13[%c40_52, %c0_53], %80 {strides = array<i32>} : memref<96x1024xf32, #tpu.memory_space<vmem>>, vector<10x22xf32>,
    %82 = vector.extract_strided_slice %71 {offsets = [0, 8], sizes = [10, 22], strides = [1, 1]} : vector<10x36xf32> to vector<10x22xf32>
    %c50 = arith.constant 50 : index
    %c0_54 = arith.constant 0 : index
    %83 = vector.load %arg13[%c50, %c0_54] : memref<96x1024xf32, #tpu.memory_space<vmem>>, vector<10x22xf32>
    tpu.vector_store %arg13[%c50, %c0_54], %82 {strides = array<i32>} : memref<96x1024xf32, #tpu.memory_space<vmem>>, vector<10x22xf32>,
    %84 = vector.extract_strided_slice %71 {offsets = [0, 12], sizes = [10, 22], strides = [1, 1]} : vector<10x36xf32> to vector<10x22xf32>
    %c60 = arith.constant 60 : index
    %c0_55 = arith.constant 0 : index
    %85 = vector.load %arg13[%c60, %c0_55] : memref<96x1024xf32, #tpu.memory_space<vmem>>, vector<10x22xf32>
    tpu.vector_store %arg13[%c60, %c0_55], %84 {strides = array<i32>} : memref<96x1024xf32, #tpu.memory_space<vmem>>, vector<10x22xf32>,
    %86 = vector.extract_strided_slice %71 {offsets = [0, 13], sizes = [10, 22], strides = [1, 1]} : vector<10x36xf32> to vector<10x22xf32>
    %c70 = arith.constant 70 : index
    %c0_56 = arith.constant 0 : index
    %87 = vector.load %arg13[%c70, %c0_56] : memref<96x1024xf32, #tpu.memory_space<vmem>>, vector<10x22xf32>
    tpu.vector_store %arg13[%c70, %c0_56], %86 {strides = array<i32>} : memref<96x1024xf32, #tpu.memory_space<vmem>>, vector<10x22xf32>,
    %88 = vector.extract_strided_slice %71 {offsets = [0, 14], sizes = [10, 22], strides = [1, 1]} : vector<10x36xf32> to vector<10x22xf32>
    %c80 = arith.constant 80 : index
    %c0_57 = arith.constant 0 : index
    %89 = vector.load %arg13[%c80, %c0_57] : memref<96x1024xf32, #tpu.memory_space<vmem>>, vector<10x22xf32>
    tpu.vector_store %arg13[%c80, %c0_57], %88 {strides = array<i32>} : memref<96x1024xf32, #tpu.memory_space<vmem>>, vector<10x22xf32>,
    %c0_58 = arith.constant 0 : index
    %c0_59 = arith.constant 0 : index
    %90 = vector.load %arg13[%c0_58, %c0_59] : memref<96x1024xf32, #tpu.memory_space<vmem>>, vector<90x22xf32>
    %c0_60 = arith.constant 0 : index
    %c0_61 = arith.constant 0 : index
    %91 = vector.load %arg8[%c0_60, %c0_61] : memref<10x90xf32, #tpu.memory_space<vmem>>, vector<10x90xf32>
    %cst_62 = arith.constant dense<0.000000e+00> : vector<10x22xf32>
    %92 = tpu.matmul %91, %90, %cst_62 {dimension_numbers = #tpu.dot_dimension_numbers<[1], [0], [0], [1], [0, 0, 1, 1], [], []>} : vector<10x90xf32>, vector<90x22xf32>, vector<10x22xf32> -> vector<10x22xf32>
    %c0_63 = arith.constant 0 : index
    %c0_64 = arith.constant 0 : index
    %93 = vector.load %arg9[%c0_63, %c0_64] : memref<10x1xf32, #tpu.memory_space<vmem>>, vector<10x1xf32>
    %94 = vector.broadcast %93 : vector<10x1xf32> to vector<10x22xf32>
    %95 = arith.addf %92, %94 : vector<10x22xf32>
    %cst_65 = arith.constant 0.000000e+00 : f32
    %96 = vector.broadcast %cst_65 : f32 to vector<10x22xf32>
    %97 = arith.maximumf %95, %96 : vector<10x22xf32>
    %98 = vector.extract_strided_slice %97 {offsets = [0, 0], sizes = [10, 15], strides = [1, 1]} : vector<10x22xf32> to vector<10x15xf32>
    %99 = vector.extract_strided_slice %97 {offsets = [0, 1], sizes = [10, 15], strides = [1, 1]} : vector<10x22xf32> to vector<10x15xf32>
    %100 = arith.maximumf %98, %99 : vector<10x15xf32>
    %101 = vector.extract_strided_slice %97 {offsets = [0, 6], sizes = [10, 15], strides = [1, 1]} : vector<10x22xf32> to vector<10x15xf32>
    %102 = vector.extract_strided_slice %97 {offsets = [0, 7], sizes = [10, 15], strides = [1, 1]} : vector<10x22xf32> to vector<10x15xf32>
    %103 = arith.maximumf %101, %102 : vector<10x15xf32>
    %104 = arith.maximumf %100, %103 : vector<10x15xf32>
    %c0_66 = arith.constant 0 : index
    %c0_67 = arith.constant 0 : index
    %105 = vector.load %arg11[%c0_66, %c0_67] : memref<10x1xf32, #tpu.memory_space<vmem>>, vector<10x1xf32>
    %c0_68 = arith.constant 0 : index
    %c0_69 = arith.constant 0 : index
    %c0_70 = arith.constant 0 : index
    %106 = vector.load %arg10[%c0_68, %c0_69, %c0_70] : memref<4x10x10xf32, #tpu.memory_space<vmem>>, vector<1x10x10xf32>
    %107 = vector.shape_cast %106 : vector<1x10x10xf32> to vector<10x10xf32>
    %108 = vector.extract_strided_slice %104 {offsets = [0, 0], sizes = [10, 1], strides = [1, 1]} : vector<10x15xf32> to vector<10x1xf32>
    %cst_71 = arith.constant dense<0.000000e+00> : vector<10x1xf32>
    %109 = tpu.matmul %107, %108, %cst_71 {dimension_numbers = #tpu.dot_dimension_numbers<[1], [0], [0], [1], [0, 0, 1, 1], [], []>} : vector<10x10xf32>, vector<10x1xf32>, vector<10x1xf32> -> vector<10x1xf32>
    %110 = arith.addf %105, %109 : vector<10x1xf32>
    %c1 = arith.constant 1 : index
    %c0_72 = arith.constant 0 : index
    %c0_73 = arith.constant 0 : index
    %111 = vector.load %arg10[%c1, %c0_72, %c0_73] : memref<4x10x10xf32, #tpu.memory_space<vmem>>, vector<1x10x10xf32>
    %112 = vector.shape_cast %111 : vector<1x10x10xf32> to vector<10x10xf32>
    %113 = vector.extract_strided_slice %104 {offsets = [0, 2], sizes = [10, 1], strides = [1, 1]} : vector<10x15xf32> to vector<10x1xf32>
    %cst_74 = arith.constant dense<0.000000e+00> : vector<10x1xf32>
    %114 = tpu.matmul %112, %113, %cst_74 {dimension_numbers = #tpu.dot_dimension_numbers<[1], [0], [0], [1], [0, 0, 1, 1], [], []>} : vector<10x10xf32>, vector<10x1xf32>, vector<10x1xf32> -> vector<10x1xf32>
    %115 = arith.addf %110, %114 : vector<10x1xf32>
    %c2 = arith.constant 2 : index
    %c0_75 = arith.constant 0 : index
    %c0_76 = arith.constant 0 : index
    %116 = vector.load %arg10[%c2, %c0_75, %c0_76] : memref<4x10x10xf32, #tpu.memory_space<vmem>>, vector<1x10x10xf32>
    %117 = vector.shape_cast %116 : vector<1x10x10xf32> to vector<10x10xf32>
    %118 = vector.extract_strided_slice %104 {offsets = [0, 12], sizes = [10, 1], strides = [1, 1]} : vector<10x15xf32> to vector<10x1xf32>
    %cst_77 = arith.constant dense<0.000000e+00> : vector<10x1xf32>
    %119 = tpu.matmul %117, %118, %cst_77 {dimension_numbers = #tpu.dot_dimension_numbers<[1], [0], [0], [1], [0, 0, 1, 1], [], []>} : vector<10x10xf32>, vector<10x1xf32>, vector<10x1xf32> -> vector<10x1xf32>
    %120 = arith.addf %115, %119 : vector<10x1xf32>
    %c3_78 = arith.constant 3 : index
    %c0_79 = arith.constant 0 : index
    %c0_80 = arith.constant 0 : index
    %121 = vector.load %arg10[%c3_78, %c0_79, %c0_80] : memref<4x10x10xf32, #tpu.memory_space<vmem>>, vector<1x10x10xf32>
    %122 = vector.shape_cast %121 : vector<1x10x10xf32> to vector<10x10xf32>
    %123 = vector.extract_strided_slice %104 {offsets = [0, 14], sizes = [10, 1], strides = [1, 1]} : vector<10x15xf32> to vector<10x1xf32>
    %cst_81 = arith.constant dense<0.000000e+00> : vector<10x1xf32>
    %124 = tpu.matmul %122, %123, %cst_81 {dimension_numbers = #tpu.dot_dimension_numbers<[1], [0], [0], [1], [0, 0, 1, 1], [], []>} : vector<10x10xf32>, vector<10x1xf32>, vector<10x1xf32> -> vector<10x1xf32>
    %125 = arith.addf %120, %124 : vector<10x1xf32>
    %cst_82 = arith.constant dense<0xFF800000> : vector<1xf32>
    %126 = vector.multi_reduction <maximumf>, %125, %cst_82 [0] : vector<10x1xf32> to vector<1xf32>
    %127 = vector.shape_cast %126 : vector<1xf32> to vector<1x1xf32>
    %128 = vector.broadcast %127 : vector<1x1xf32> to vector<10x1xf32>
    %129 = arith.subf %125, %128 : vector<10x1xf32>
    %130 = math.exp %129 : vector<10x1xf32>
    %cst_83 = arith.constant dense<0.000000e+00> : vector<1xf32>
    %131 = vector.multi_reduction <add>, %130, %cst_83 [0] : vector<10x1xf32> to vector<1xf32>
    %132 = vector.shape_cast %131 : vector<1xf32> to vector<1x1xf32>
    %133 = math.log %132 : vector<1x1xf32>
    %134 = arith.addf %127, %133 : vector<1x1xf32>
    %135 = vector.broadcast %134 : vector<1x1xf32> to vector<10x1xf32>
    %136 = arith.subf %125, %135 : vector<10x1xf32>
    %c0_84 = arith.constant 0 : index
    %c0_85 = arith.constant 0 : index
    %c0_86 = arith.constant 0 : index
    %137 = vector.load %arg12[%c0_84, %c0_85, %c0_86] : memref<1x10x1xf32, #tpu.memory_space<vmem>>, vector<1x10x1xf32>
    %138 = vector.shape_cast %137 : vector<1x10x1xf32> to vector<10x1xf32>
    %139 = vector.shape_cast %136 : vector<10x1xf32> to vector<1x10x1xf32>
    tpu.vector_store %arg12[%c0_84, %c0_85, %c0_86], %139 {strides = array<i32>} : memref<1x10x1xf32, #tpu.memory_space<vmem>>, vector<1x10x1xf32>,
    return
  }
  func.func @transform_0(%arg0: i32) -> (i32, i32, i32) {
    %c0_i32 = arith.constant 0 : i32
    %c0_i32_0 = arith.constant 0 : i32
    %c0_i32_1 = arith.constant 0 : i32
    return %arg0, %c0_i32, %c0_i32_0 : i32, i32, i32
  }
  func.func @transform_1(%arg0: i32) -> (i32, i32) {
    %c0_i32 = arith.constant 0 : i32
    %c0_i32_0 = arith.constant 0 : i32
    %c0_i32_1 = arith.constant 0 : i32
    return %c0_i32, %c0_i32_0 : i32, i32
  }
  func.func @transform_2(%arg0: i32) -> (i32, i32) {
    %c0_i32 = arith.constant 0 : i32
    %c0_i32_0 = arith.constant 0 : i32
    %c0_i32_1 = arith.constant 0 : i32
    return %c0_i32, %c0_i32_0 : i32, i32
  }
  func.func @transform_3(%arg0: i32) -> (i32, i32) {
    %c0_i32 = arith.constant 0 : i32
    %c0_i32_0 = arith.constant 0 : i32
    %c0_i32_1 = arith.constant 0 : i32
    return %c0_i32, %c0_i32_0 : i32, i32
  }
  func.func @transform_4(%arg0: i32) -> (i32, i32) {
    %c0_i32 = arith.constant 0 : i32
    %c0_i32_0 = arith.constant 0 : i32
    %c0_i32_1 = arith.constant 0 : i32
    return %c0_i32, %c0_i32_0 : i32, i32
  }
  func.func @transform_5(%arg0: i32) -> (i32, i32) {
    %c0_i32 = arith.constant 0 : i32
    %c0_i32_0 = arith.constant 0 : i32
    %c0_i32_1 = arith.constant 0 : i32
    return %c0_i32, %c0_i32_0 : i32, i32
  }
  func.func @transform_6(%arg0: i32) -> (i32, i32) {
    %c0_i32 = arith.constant 0 : i32
    %c0_i32_0 = arith.constant 0 : i32
    %c0_i32_1 = arith.constant 0 : i32
    return %c0_i32, %c0_i32_0 : i32, i32
  }
  func.func @transform_7(%arg0: i32) -> (i32, i32) {
    %c0_i32 = arith.constant 0 : i32
    %c0_i32_0 = arith.constant 0 : i32
    %c0_i32_1 = arith.constant 0 : i32
    return %c0_i32, %c0_i32_0 : i32, i32
  }
  func.func @transform_8(%arg0: i32) -> (i32, i32) {
    %c0_i32 = arith.constant 0 : i32
    %c0_i32_0 = arith.constant 0 : i32
    %c0_i32_1 = arith.constant 0 : i32
    return %c0_i32, %c0_i32_0 : i32, i32
  }
  func.func @transform_9(%arg0: i32) -> (i32, i32, i32) {
    %c0_i32 = arith.constant 0 : i32
    %c0_i32_0 = arith.constant 0 : i32
    %c0_i32_1 = arith.constant 0 : i32
    %c0_i32_2 = arith.constant 0 : i32
    return %c0_i32, %c0_i32_0, %c0_i32_1 : i32, i32, i32
  }
  func.func @transform_10(%arg0: i32) -> (i32, i32) {
    %c0_i32 = arith.constant 0 : i32
    %c0_i32_0 = arith.constant 0 : i32
    %c0_i32_1 = arith.constant 0 : i32
    return %c0_i32, %c0_i32_0 : i32, i32
  }
  func.func @transform_11(%arg0: i32) -> (i32, i32, i32) {
    %c0_i32 = arith.constant 0 : i32
    %c0_i32_0 = arith.constant 0 : i32
    %c0_i32_1 = arith.constant 0 : i32
    return %arg0, %c0_i32, %c0_i32_0 : i32, i32, i32
  }
}

</mosaic_0001>

<bundles_post_ra>
// kernel: tpu_custom_call.1
= control target key start
LH: loop header
LB: loop body
LE: loop exit
PB: predicated region body
PF: predicated region fallthrough
CT: control target
= control target key end

     0   :  { %16 = vsyncpa [#allocation4], 0  ;;  %s3653_s17 = smov 0   ;;  %s4466_s0 = inlined_call_operand.vmem [shape: f32[2,3,1024], index: 0, kind: input, shape index: {}]   ;;  %s4467_s1 = inlined_call_operand.vmem [shape: f32[5,27], index: 1, kind: input, shape index: {}]   ;;  %s4468_s2 = inlined_call_operand.vmem [shape: f32[5,1], index: 2, kind: input, shape index: {}]   ;;  %s4469_s3 = inlined_call_operand.hbm [shape: f32[925,225], index: 3, kind: input, shape index: {}]   ;;  %s4470_s4 = inlined_call_operand.vmem [shape: f32[10,45], index: 4, kind: input, shape index: {}]   ;;  %s4471_s5 = inlined_call_operand.vmem [shape: f32[10,1], index: 5, kind: input, shape index: {}]   ;;  %s4472_s6 = inlined_call_operand.vmem [shape: f32[177,36], index: 6, kind: input, shape index: {}]   ;;  %s4473_s7 = inlined_call_operand.vmem [shape: f32[10,90], index: 7, kind: input, shape index: {}]   ;;  %s4474_s8 = inlined_call_operand.vmem [shape: f32[10,1], index: 8, kind: input, shape index: {}]   ;;  %s4475_s9 = inlined_call_operand.vmem [shape: f32[4,10,10], index: 9, kind: input, shape index: {}]   ;;  %s4476_s10 = inlined_call_operand.vmem [shape: f32[10,1], index: 10, kind: input, shape index: {}]   ;;  %s4477_s11 = inlined_call_operand.vmem [shape: f32[2,10,1], index: 11, kind: output, shape index: {}]  }
   0x1 LB: > { %s3659_s18 = sadd.s32 4294967295, %s3565_s17   ;;  %p2886_p0 = scmp.ge.s32.totalorder %s3565_s17, 1  ;;  %s3565_s17 = sphi %s3653_s17, %s22_s17  }
   0x2   : > { %p289_p1 = scmp.lt.s32.totalorder %s3565_s17, 3  ;;  %s3567_s19 = smov [#allocation3]  }
   0x3   : > { %s307_s20 = sshll.u32 %s3567_s19, 4  ;;  %p4478_p3 = scmp.eq.s32.totalorder %s3659_s18, 0  ;;  %s308_s20 = int_to_ptr.vmem [resolvable:$true] %s307_s20 }
   0x4   : > { %p3663_p2 = pnand %p2886_p0, %p289_p1  ;;  %s3527_s25 = scalar_lea.hbm %s4469_s3, 29696 }
   0x5   : > { %p3528_p6 = scmp.ne.s32.totalorder %s4469_s3, %s3527_s25  ;;  %p3534_p10 = scmp.lt.u32.totalorder %s3527_s25, %s4469_s3 }
   0x6   : > { %s4482_s21 = scalar_select %p3663_p2, 1, 0 }
   0x7   : > { %p3416_p4 = pneg %p3663_p2 }
   0x9   : > { %p3672_p5 = pnand %p4478_p3, %p3416_p4 }
   0xb   : > { %p3529_p7 = pneg %p3672_p5 }
   0xd   : > { %p3530_p8 = pnand %p3529_p7, %p3528_p6 }
   0xf   : > { %p3531_p9 = pneg %p3530_p8 }
  0x11   : > { %p3536_p11 = pnand %p3534_p10, %p3531_p9 }
  0x13   : > { %3539 = shalt.err (!%p3536_p11)
}
  0x14   : > { %s3540_s30 = scalar_lea.vmem %s308_s20, 29696  ;;  %p3548_p1 = scmp.lt.s32.totalorder %s308_s20, %s308_s20 }
  0x15   : > { %p3541_p12 = scmp.ne.s32.totalorder %s308_s20, %s3540_s30  ;;  %p3549_p4 = scmp.lt.s32.totalorder %s3540_s30, %s3540_s30 }
  0x17   : > { %p3543_p13 = pnand %p3541_p12, %p3529_p7  ;;  %p3550_p3 = por %p3549_p4, %p3548_p1 }
  0x19   : > { %p3544_p0 = pneg %p3543_p13 }
  0x1b   : > { %p3551_p2 = pnand %p3550_p3, %p3544_p0 }
  0x1d   : > { %3554 = shalt.err (!%p3551_p2)
}
  0x1e   : > { %s3568_s12 = smov 256   ;;  %s3569_s13 = smov 16  }
  0x1f   : > { %3419 = dma.hbm_to_vmem [thread:$0]  (!%p3672_p5), %s4469_s3, 29696, %s308_s20, [#allocation4], %s3568_s12, %s3568_s12, %s3569_s13  }
  0x20   : > { %p4484_p6 = scmp.ne.s32.totalorder %s4482_s21, 0 }
  0x21   : > { %p4485_p8 = scmp.eq.s32.totalorder (!%p4484_p6), %s3659_s18, 0 }
  0x22   : > { %352 = sbr.rel (%p4484_p6) target bundleno = 2997 (0xbb5), region = 64 }
  0x29   : > { %3560 = dma.done.wait (%p4485_p8), [#allocation4], 29696   ;;  %p4486_p7 = pmov %p4485_p8 }
  0x2a   : > { %p392_p2 = scmp.lt.s32.totalorder %s3659_s18, 1  ;;  %s3570_s21 = smov 95   ;;  %v3578_v46 = vmov 0.0   ;;  %vm425_vm0 = vcmask 501760   ;;  %vm451_vm1 = vcmask 1039360   ;;  %vm603_vm2 = vcmask 777216  }
  0x2b   : > { %3562 = vsyncadd (%p4486_p7), [#allocation4], 4294937600  ;;  %s3571_s23 = smov 126   ;;  %s3572_s24 = smov 127   ;;  %956 = vmatprep.mubr.f32.mxu0 %v3578_v46  ;;  %1027 = vmatprep.mubr.f32.mxu1 %v3578_v46  ;;  %vm558_vm3 = vcmask 785408   ;;  %vm500_vm4 = vcmask 1031168  }
  0x2c   : > { %s4495_s18 = smov (!%p392_p2, %s3659_s18), 1  ;;  %s3573_s25 = smov 96   ;;  %vm652_vm5 = vcmask 769024   ;;  %vm710_vm6 = vcmask 523264   ;;  %vm759_vm7 = vcmask 515072   ;;  %vm800_vm8 = vcmask 506880  }
  0x2d   : > { %s2940_s16 = sshll.u32 %s4495_s18, 5  ;;  %s3574_s26 = smov 94   ;;  %vm867_vm9 = vcmask 1042432   ;;  %vm4480_vm10 = vmmov 1   ;;  %vm863_vm12 = vcmask 220160   ;;  %vm474_vm13 = vcmask 504835  }
  0x2e   : > { %s396_s20 = scalar_lea.vmem %s4466_s0, %s2940_s16  ;;  %s3575_s27 = smov 64   ;;  %vm3899_vm11 = vmpackc.low %vm867_vm9, %vm4480_vm10  ;;  %vm523_vm14 = vcmask 506886   ;;  %vm532_vm15 = vcmask 499712   ;;  %vm581_vm9 = vcmask 502785   ;;  %vm626_vm10 = vcmask 505860  }
  0x2f   : > { %v3706_v0 = vld [vmem:[%s396_s20] sm:$0x77]  ;;  %v3708_v1 = vld [vmem:[%s396_s20 + $0x8] sm:$0x77]  ;;  %v3710_v2 = vld [vmem:[%s396_s20 + $0x10] sm:$0x77] }
  0x30   : > { %589 = vrot.lane.b32.xlu0 %v3706_v0, %s3570_s21  ;;  %418 = vst [vmem:[#allocation2] sm:$0x7] %v3706_v0  ;;  %v478_v3 = vrot.slane %v3708_v1, 2  ;;  %420 = vst [vmem:[#allocation2 + $0x10] sm:$0x7] %v3708_v1  ;;  %v429_v4 = vrot.slane %v3708_v1, 5  ;;  %v410_v5 = vcombine.high %v3706_v0, %v3706_v0  ;;  %v3729_v9 = vcombine.high %v3708_v1, %v3708_v1 }
  0x31   : > { %422 = vst [vmem:[#allocation2 + $0x20] sm:$0x7] %v3710_v2  ;;  %v3721_v6 = vld [vmem:[%s396_s20 + $0x18] sm:$0x77]  ;;  %v536_v7 = vrot.slane %v3708_v1, 7  ;;  %v3733_v10 = vcombine.high %v3710_v2, %v3710_v2  ;;  %v584_v11 = vcombine.low %v3708_v1, %v3708_v1  ;;  %v630_v15 = vrot.slane %v3708_v1, 1 }
  0x32   : > { %424 = vst [vmem:[#allocation2 + $0x30] sm:$0x7] %v3721_v6  ;;  %488 = vrot.lane.b32.xlu1 %v478_v3, %s3571_s23  ;;  %419 = vst [vmem:[#allocation2 + $0x8] sm:$0x7] %v410_v5  ;;  %v428_v8 = vrot.slane %v410_v5, 5  ;;  %v535_v12 = vrot.slane %v410_v5, 7  ;;  %v583_v19 = vcombine.low %v3706_v0, %v3706_v0  ;;  %v585_v39 = vcombine.low %v3710_v2, %v3710_v2 }
  0x33   : > { %421 = vst [vmem:[#allocation2 + $0x18] sm:$0x7] %v3729_v9  ;;  %423 = vst [vmem:[#allocation2 + $0x28] sm:$0x7] %v3733_v10  ;;  %v477_v13 = vrot.slane %v410_v5, 2  ;;  %v629_v14 = vrot.slane %v410_v5, 1  ;;  %v586_v40 = vcombine.low %v3721_v6, %v3721_v6  ;;  %v413_v54 = vcombine.high %v3721_v6, %v3721_v6 }
  0x34   : > { %439 = vrot.lane.b32.xlu0 %v429_v4, %s3572_s24  ;;  %v427_v16 = vrot.slane %v3706_v0, 5  ;;  %v476_v17 = vrot.slane %v3706_v0, 2  ;;  %v534_v18 = vrot.slane %v3706_v0, 7  ;;  %v628_v20 = vrot.slane %v3706_v0, 1  ;;  %s3576_s28 = smov 63   ;;  %s3577_s29 = smov 62  }
  0x35   : > { %v687_v21 = vrot.slane %v410_v5, 6  ;;  %v688_v22 = vrot.slane %v3708_v1, 6  ;;  %v736_v23 = vrot.slane %v410_v5, 3  ;;  %v737_v24 = vrot.slane %v3708_v1, 3  ;;  %426 = vst.msk [vmem:[#allocation2 + $0x38] sm:$0x7] %vm425_vm0, %v413_v54 }
  0x36   : > { %546 = vrot.lane.b32.xlu1 %v536_v7, %s3573_s25  ;;  %v686_v25 = vrot.slane %v3706_v0, 6  ;;  %v735_v26 = vrot.slane %v3706_v0, 3  ;;  %v430_v27 = vrot.slane %v3729_v9, 5  ;;  %v431_v28 = vrot.slane %v3710_v2, 5  ;;  %v857_v7 = vld [vmem:[%s4468_s2] sm:$0x1f] }
  0x37   : > { %v432_v29 = vrot.slane %v3733_v10, 5  ;;  %v433_v30 = vrot.slane %v3721_v6, 5  ;;  %v479_v31 = vrot.slane %v3729_v9, 2  ;;  %v480_v32 = vrot.slane %v3710_v2, 2  ;;  %s3581_s15 = smov 113   ;;  %s3582_s16 = smov 112  }
  0x38   : > { %437 = vrot.lane.b32.xlu0 %v428_v8, %s3572_s24  ;;  %v481_v33 = vrot.slane %v3733_v10, 2  ;;  %v482_v34 = vrot.slane %v3721_v6, 2  ;;  %v537_v35 = vrot.slane %v3729_v9, 7  ;;  %v538_v36 = vrot.slane %v3710_v2, 7  ;;  %s3583_s19 = smov 111   ;;  %s3584_s22 = smov 98  }
  0x39   : > { %v539_v37 = vrot.slane %v3733_v10, 7  ;;  %v540_v38 = vrot.slane %v3721_v6, 7  ;;  %v631_v41 = vrot.slane %v3729_v9, 1  ;;  %v632_v42 = vrot.slane %v3710_v2, 1  ;;  %s3585_s20 = smov 97  }
  0x3a   : > { %591 = vrot.lane.b32.xlu1 %v584_v11, %s3570_s21  ;;  %v633_v43 = vrot.slane %v3733_v10, 1  ;;  %v634_v44 = vrot.slane %v3721_v6, 1  ;;  %v689_v45 = vrot.slane %v3729_v9, 6  ;;  %v690_v47 = vrot.slane %v3710_v2, 6 }
  0x3b   : > { %v691_v48 = vrot.slane %v3733_v10, 6  ;;  %v692_v49 = vrot.slane %v3721_v6, 6  ;;  %v738_v50 = vrot.slane %v3729_v9, 3  ;;  %v739_v51 = vrot.slane %v3710_v2, 3 }
  0x3c   : > { %544 = vrot.lane.b32.xlu0 %v535_v12, %s3573_s25  ;;  %v740_v52 = vrot.slane %v3733_v10, 3  ;;  %v741_v53 = vrot.slane %v3721_v6, 3  ;;  %v434_v55 = vrot.slane %v413_v54, 5  ;;  %v483_v56 = vrot.slane %v413_v54, 2 }
  0x3d   : > { %v541_v57 = vrot.slane %v413_v54, 7  ;;  %v635_v60 = vrot.slane %v413_v54, 1  ;;  %v693_v62 = vrot.slane %v413_v54, 6 }
  0x3e   : > { %486 = vrot.lane.b32.xlu1 %v477_v13, %s3571_s23 }
  0x40   : > { %638 = vrot.lane.b32.xlu0 %v629_v14, %s3574_s26 }
  0x42   : > { %640 = vrot.lane.b32.xlu1 %v630_v15, %s3574_s26 }
  0x44   : > { %435 = vrot.lane.b32.xlu0 %v427_v16, %s3572_s24 }
  0x46   : > { %484 = vrot.lane.b32.xlu1 %v476_v17, %s3571_s23 }
  0x48   : > { %542 = vrot.lane.b32.xlu0 %v534_v18, %s3573_s25 }
  0x4a   : > { %587 = vrot.lane.b32.xlu1 %v583_v19, %s3570_s21 }
  0x4c   : > { %636 = vrot.lane.b32.xlu0 %v628_v20, %s3574_s26 }
  0x4e   : > { %696 = vrot.lane.b32.xlu1 %v687_v21, %s3575_s27 }
  0x50   : > { %698 = vrot.lane.b32.xlu0 %v688_v22, %s3575_s27 }
  0x52   : > { %745 = vrot.lane.b32.xlu1 %v736_v23, %s3576_s28 }
  0x54   : > { %747 = vrot.lane.b32.xlu0 %v737_v24, %s3576_s28 }
  0x56   : > { %786 = vrot.lane.b32.xlu1 %v410_v5, %s3577_s29 }
  0x58   : > { %788 = vrot.lane.b32.xlu0 %v3708_v1, %s3577_s29 }
  0x5a   : > { %694 = vrot.lane.b32.xlu1 %v686_v25, %s3575_s27 }
  0x5c   : > { %743 = vrot.lane.b32.xlu0 %v735_v26, %s3576_s28 }
  0x5e   : > { %784 = vrot.lane.b32.xlu1 %v3706_v0, %s3577_s29  ;;  %v742_v0 = vrot.slane %v413_v54, 3 }
  0x60   : > { %441 = vrot.lane.b32.xlu0 %v430_v27, %s3572_s24 }
  0x62   : > { %443 = vrot.lane.b32.xlu1 %v431_v28, %s3572_s24 }
  0x64   : > { %445 = vrot.lane.b32.xlu0 %v432_v29, %s3572_s24 }
  0x66   : > { %447 = vrot.lane.b32.xlu1 %v433_v30, %s3572_s24 }
  0x68   : > { %490 = vrot.lane.b32.xlu0 %v479_v31, %s3571_s23 }
  0x6a   : > { %492 = vrot.lane.b32.xlu1 %v480_v32, %s3571_s23 }
  0x6c   : > { %494 = vrot.lane.b32.xlu0 %v481_v33, %s3571_s23 }
  0x6e   : > { %496 = vrot.lane.b32.xlu1 %v482_v34, %s3571_s23 }
  0x70   : > { %548 = vrot.lane.b32.xlu0 %v537_v35, %s3573_s25 }
  0x72   : > { %550 = vrot.lane.b32.xlu1 %v538_v36, %s3573_s25 }
  0x74   : > { %552 = vrot.lane.b32.xlu0 %v539_v37, %s3573_s25 }
  0x76   : > { %554 = vrot.lane.b32.xlu1 %v540_v38, %s3573_s25 }
  0x78   : > { %593 = vrot.lane.b32.xlu0 %v3708_v1, %s3570_s21 }
  0x7a   : > { %595 = vrot.lane.b32.xlu1 %v585_v39, %s3570_s21 }
  0x7c   : > { %597 = vrot.lane.b32.xlu0 %v3710_v2, %s3570_s21 }
  0x7e   : > { %599 = vrot.lane.b32.xlu1 %v586_v40, %s3570_s21 }
  0x80   : > { %642 = vrot.lane.b32.xlu0 %v631_v41, %s3574_s26 }
  0x82   : > { %644 = vrot.lane.b32.xlu1 %v632_v42, %s3574_s26 }
  0x84   : > { %646 = vrot.lane.b32.xlu0 %v633_v43, %s3574_s26 }
  0x86   : > { %648 = vrot.lane.b32.xlu1 %v634_v44, %s3574_s26 }
  0x88   : > { %700 = vrot.lane.b32.xlu0 %v689_v45, %s3575_s27 }
  0x8a   : > { %702 = vrot.lane.b32.xlu1 %v690_v47, %s3575_s27 }
  0x8c   : > { %704 = vrot.lane.b32.xlu0 %v691_v48, %s3575_s27 }
  0x8e   : > { %706 = vrot.lane.b32.xlu1 %v692_v49, %s3575_s27 }
  0x90   : > { %749 = vrot.lane.b32.xlu0 %v738_v50, %s3576_s28 }
  0x92   : > { %751 = vrot.lane.b32.xlu1 %v739_v51, %s3576_s28 }
  0x94   : > { %753 = vrot.lane.b32.xlu0 %v740_v52, %s3576_s28 }
  0x96   : > { %755 = vrot.lane.b32.xlu1 %v741_v53, %s3576_s28 }
  0x98   : > { %790 = vrot.lane.b32.xlu0 %v3729_v9, %s3577_s29  ;;  %v3579_v9 = vmov 0  }
  0x99   : > { %3456 = vset.pattern.permute.xlu0 %v3579_v9  ;;  %3487 = vset.pattern.permute.xlu1 %v3579_v9 }
  0x9a   : > { %792 = vrot.lane.b32.xlu1 %v3710_v2, %s3577_s29 }
  0x9c   : > { %794 = vrot.lane.b32.xlu0 %v3733_v10, %s3577_s29 }
  0x9e   : > { %796 = vrot.lane.b32.xlu1 %v3721_v6, %s3577_s29 }
  0xa0   : > { %449 = vrot.lane.b32.xlu0 %v434_v55, %s3572_s24 }
  0xa2   : > { %v590_v58 = vpop.permute.xlu0 %589  ;;  %498 = vrot.lane.b32.xlu1 %v483_v56, %s3571_s23 }
  0xa4   : > { %v3846_v59 = vpop.permute.xlu1 %488  ;;  %556 = vrot.lane.b32.xlu0 %v541_v57, %s3573_s25 }
  0xa6   : > { %v3849_v61 = vpop.permute.xlu0 %439  ;;  %601 = vrot.lane.b32.xlu1 %v3721_v6, %s3570_s21  ;;  %s3590_s21 = smov 116  }
  0xa8   : > { %v3853_v63 = vpop.permute.xlu1 %546  ;;  %650 = vrot.lane.b32.xlu0 %v635_v60, %s3574_s26  ;;  %s3591_s26 = smov 115  }
  0xaa   : > { %708 = vrot.lane.b32.xlu1 %v693_v62, %s3575_s27  ;;  %v438_v1 = vpop.permute.xlu0 %437  ;;  %s3592_s27 = smov 114  }
  0xab   : > { %v453_v2 = vsel %vm451_vm1, %v438_v1, %v3849_v61 }
  0xac   : > { %468 = vst [vmem:[#allocation2 + $0x8] sm:$0x38] %v453_v2  ;;  %v3859_v3 = vpop.permute.xlu1 %591  ;;  %757 = vrot.lane.b32.xlu0 %v742_v0, %s3576_s28  ;;  %v3918_v2 = vld [vmem:[%s4467_s1] sm:$0x1f] }
  0xad   : > { %v605_v4 = vsel %vm603_vm2, %v590_v58, %v3859_v3 }
  0xae   : > { %620 = vst [vmem:[#allocation2 + $0x48] sm:$0x70] %v605_v4  ;;  %798 = vrot.lane.b32.xlu1 %v413_v54, %s3577_s29  ;;  %v545_v5 = vpop.permute.xlu0 %544 }
  0xaf   : > { %v560_v6 = vsel %vm558_vm3, %v545_v5, %v3853_v63 }
  0xb0   : > { %575 = vst [vmem:[#allocation2 + $0x48] sm:$0xe] %v560_v6  ;;  %v487_v8 = vpop.permute.xlu1 %486  ;;  %860 = vperm.xlu0 %3456, %v857_v7  }
  0xb1   : > { %v502_v10 = vsel %vm500_vm4, %v487_v8, %v3846_v59 }
  0xb2   : > { %517 = vst [vmem:[#allocation2 + $0x48] ss:$-60 sps:$4 sm:$0xc1] %v502_v10   ;;  %v639_v11 = vpop.permute.xlu0 %638 }
  0xb4   : > { %v3872_v12 = vpop.permute.xlu1 %640 }
  0xb5   : > { %v654_v13 = vsel %vm652_vm5, %v639_v11, %v3872_v12 }
  0xb6   : > { %669 = vst [vmem:[#allocation2 + $0x88] ss:$-60 sps:$4 sm:$0x83] %v654_v13   ;;  %v436_v14 = vpop.permute.xlu0 %435 }
  0xb7   : > { %v452_v15 = vsel %vm451_vm1, %v436_v14, %v438_v1 }
  0xb8   : > { %467 = vst [vmem:[#allocation2] sm:$0x38] %v452_v15  ;;  %v485_v16 = vpop.permute.xlu1 %484 }
  0xb9   : > { %v501_v17 = vsel %vm500_vm4, %v485_v16, %v487_v8  ;;  %v825_v22 = vld [vmem:[#allocation2 + $0x8] sm:$0xff] }
  0xba   : > { %516 = vst [vmem:[#allocation2 + $0x40] ss:$-60 sps:$4 sm:$0xc1] %v501_v17   ;;  %v543_v18 = vpop.permute.xlu0 %542 }
  0xbb   : > { %v559_v19 = vsel %vm558_vm3, %v543_v18, %v545_v5 }
  0xbc   : > { %574 = vst [vmem:[#allocation2 + $0x40] sm:$0xe] %v559_v19  ;;  %v588_v20 = vpop.permute.xlu1 %587 }
  0xbd   : > { %v604_v21 = vsel %vm603_vm2, %v588_v20, %v590_v58  ;;  %v833_v23 = vld [vmem:[#allocation2 + $0x48] sm:$0xff] }
  0xbe   : > { %619 = vst [vmem:[#allocation2 + $0x40] sm:$0x70] %v604_v21  ;;  %v637_v24 = vpop.permute.xlu0 %636  ;;  %v3027_v25 = vpack.c.bf16 %v833_v23, %v825_v22 }
  0xbf   : > { %v653_v26 = vsel %vm652_vm5, %v637_v24, %v639_v11 }
  0xc0   : > { %668 = vst [vmem:[#allocation2 + $0x80] ss:$-60 sps:$4 sm:$0x83] %v653_v26   ;;  %v697_v27 = vpop.permute.xlu1 %696  ;;  %3028 = vmatprep.subr.bf16.mxu0 %v3027_v25 }
  0xc1   : > { %v824_v33 = vld [vmem:[#allocation2] sm:$0xff] }
  0xc2   : > { %v3881_v28 = vpop.permute.xlu0 %698 }
  0xc3   : > { %v712_v29 = vsel %vm710_vm6, %v697_v27, %v3881_v28 }
  0xc4   : > { %727 = vst [vmem:[#allocation2 + $0x88] sm:$0x1c] %v712_v29  ;;  %v746_v30 = vpop.permute.xlu1 %745 }
  0xc6   : > { %v3885_v31 = vpop.permute.xlu0 %747 }
  0xc7   : > { %v761_v32 = vsel %vm759_vm7, %v746_v30, %v3885_v31  ;;  %v832_v34 = vld [vmem:[#allocation2 + $0x40] sm:$0xff] }
  0xc8   : > { %776 = vst [vmem:[#allocation2 + $0x88] sm:$0xe0] %v761_v32  ;;  %v787_v35 = vpop.permute.xlu1 %786  ;;  %v3029_v36 = vpack.c.bf16 %v832_v34, %v824_v33 }
  0xca   : > { %v3889_v37 = vpop.permute.xlu0 %788  ;;  %3030 = vmatpush1.bf16.msra.mxu0 %v3029_v36 }
  0xcb   : > { %v802_v38 = vsel %vm800_vm8, %v787_v35, %v3889_v37 }
  0xcc   : > { %817 = vst [vmem:[#allocation2 + $0xc8] sm:$0x7] %v802_v38  ;;  %v695_v39 = vpop.permute.xlu1 %694 }
  0xcd   : > { %v711_v40 = vsel %vm710_vm6, %v695_v39, %v697_v27 }
  0xce   : > { %726 = vst [vmem:[#allocation2 + $0x80] sm:$0x1c] %v711_v40  ;;  %v744_v41 = vpop.permute.xlu0 %743 }
  0xcf   : > { %v760_v42 = vsel %vm759_vm7, %v744_v41, %v746_v30  ;;  %v841_v48 = vld [vmem:[#allocation2 + $0x88] sm:$0xff] }
  0xd0   : > { %775 = vst [vmem:[#allocation2 + $0x80] sm:$0xe0] %v760_v42  ;;  %v785_v43 = vpop.permute.xlu1 %784 }
  0xd1   : > { %v801_v44 = vsel %vm800_vm8, %v785_v43, %v787_v35 }
  0xd2   : > { %816 = vst [vmem:[#allocation2 + $0xc0] sm:$0x7] %v801_v44  ;;  %v442_v45 = vpop.permute.xlu0 %441 }
  0xd3   : > { %v454_v47 = vsel %vm451_vm1, %v3849_v61, %v442_v45  ;;  %v849_v49 = vld [vmem:[#allocation2 + $0xc8] sm:$0x7] }
  0xd4   : > { %469 = vst [vmem:[#allocation2 + $0x10] sm:$0x38] %v454_v47  ;;  %v444_v51 = vpop.permute.xlu1 %443  ;;  %v3031_v52 = vpack.c.bf16 %v849_v49, %v841_v48 }
  0xd5   : > { %v455_v53 = vsel %vm451_vm1, %v442_v45, %v444_v51 }
  0xd6   : > { %470 = vst [vmem:[#allocation2 + $0x18] sm:$0x38] %v455_v53  ;;  %v446_v54 = vpop.permute.xlu0 %445  ;;  %3033 = vmatprep.subr.msk.bf16.mxu0 %vm3899_vm11, %v3031_v52 }
  0xd7   : > { %v456_v55 = vsel %vm451_vm1, %v444_v51, %v446_v54  ;;  %v840_v58 = vld [vmem:[#allocation2 + $0x80] sm:$0xff] }
  0xd8   : > { %471 = vst [vmem:[#allocation2 + $0x20] sm:$0x38] %v456_v55  ;;  %v3907_v56 = vpop.permute.xlu1 %447 }
  0xd9   : > { %v457_v57 = vsel %vm451_vm1, %v446_v54, %v3907_v56  ;;  %v848_v60 = vld [vmem:[#allocation2 + $0xc0] sm:$0x7] }
  0xda   : > { %472 = vst [vmem:[#allocation2 + $0x28] sm:$0x38] %v457_v57  ;;  %v491_v61 = vpop.permute.xlu0 %490  ;;  %v3034_v62 = vpack.c.bf16 %v848_v60, %v840_v58 }
  0xdb   : > { %v503_v0 = vsel %vm500_vm4, %v3846_v59, %v491_v61 }
  0xdc   : > { %518 = vst [vmem:[#allocation2 + $0x50] ss:$-60 sps:$4 sm:$0xc1] %v503_v0   ;;  %v493_v1 = vpop.permute.xlu1 %492  ;;  %3036 = vmatpush1.bf16.msk.msra.mxu0 %vm3899_vm11, %v3034_v62 }
  0xdd   : > { %v504_v4 = vsel %vm500_vm4, %v491_v61, %v493_v1 }
  0xde   : > { %519 = vst [vmem:[#allocation2 + $0x58] ss:$-60 sps:$4 sm:$0xc1] %v504_v4   ;;  %v495_v5 = vpop.permute.xlu0 %494 }
  0xdf   : > { %v505_v6 = vsel %vm500_vm4, %v493_v1, %v495_v5  ;;  %2897 = vmatmul.mubr.msk.f32.vlgmr.msra.gmra.mrb[0].mxu0 %vm863_vm12, %v3918_v2 }
  0xe0   : > { %520 = vst [vmem:[#allocation2 + $0x60] ss:$-60 sps:$4 sm:$0xc1] %v505_v6   ;;  %v3924_v59 = vpop.permute.xlu1 %496  ;;  %1098 = vmatprep.mubr.f32.mxu0 %v3578_v46 }
  0xe1   : > { %v506_v7 = vsel %vm500_vm4, %v495_v5, %v3924_v59 }
  0xe2   : > { %521 = vst [vmem:[#allocation2 + $0x68] ss:$-60 sps:$4 sm:$0xc1] %v506_v7   ;;  %v549_v8 = vpop.permute.xlu0 %548 }
  0xe3   : > { %v561_v9 = vsel %vm558_vm3, %v3853_v63, %v549_v8  ;;  %v826_v42 = vld [vmem:[#allocation2 + $0x10] sm:$0xff] }
  0xe4   : > { %576 = vst [vmem:[#allocation2 + $0x50] sm:$0xe] %v561_v9  ;;  %v551_v10 = vpop.permute.xlu1 %550 }
  0xe5   : > { %v562_v11 = vsel %vm558_vm3, %v549_v8, %v551_v10  ;;  %v827_v38 = vld [vmem:[#allocation2 + $0x18] sm:$0xff] }
  0xe6   : > { %577 = vst [vmem:[#allocation2 + $0x58] sm:$0xe] %v562_v11  ;;  %v553_v13 = vpop.permute.xlu0 %552 }
  0xe7   : > { %v563_v14 = vsel %vm558_vm3, %v551_v10, %v553_v13  ;;  %v828_v53 = vld [vmem:[#allocation2 + $0x20] sm:$0xff] }
  0xe8   : > { %578 = vst [vmem:[#allocation2 + $0x60] sm:$0xe] %v563_v14  ;;  %v3933_v15 = vpop.permute.xlu1 %554 }
  0xe9   : > { %v564_v16 = vsel %vm558_vm3, %v553_v13, %v3933_v15  ;;  %v829_v48 = vld [vmem:[#allocation2 + $0x28] sm:$0xff] }
  0xea   : > { %579 = vst [vmem:[#allocation2 + $0x68] sm:$0xe] %v564_v16  ;;  %v594_v17 = vpop.permute.xlu0 %593 }
  0xeb   : > { %v606_v18 = vsel %vm603_vm2, %v3859_v3, %v594_v17 }
  0xec   : > { %621 = vst [vmem:[#allocation2 + $0x50] sm:$0x70] %v606_v18  ;;  %v596_v63 = vpop.permute.xlu1 %595 }
  0xed   : > { %v607_v19 = vsel %vm603_vm2, %v594_v17, %v596_v63 }
  0xee   : > { %622 = vst [vmem:[#allocation2 + $0x58] sm:$0x70] %v607_v19  ;;  %v598_v20 = vpop.permute.xlu0 %597 }
  0xef   : > { %v608_v21 = vsel %vm603_vm2, %v596_v63, %v598_v20 }
  0xf0   : > { %623 = vst [vmem:[#allocation2 + $0x60] sm:$0x70] %v608_v21  ;;  %v3941_v22 = vpop.permute.xlu1 %599 }
  0xf1   : > { %v609_v23 = vsel %vm603_vm2, %v598_v20, %v3941_v22 }
  0xf2   : > { %624 = vst [vmem:[#allocation2 + $0x68] sm:$0x70] %v609_v23  ;;  %v643_v24 = vpop.permute.xlu0 %642 }
  0xf3   : > { %v655_v25 = vsel %vm652_vm5, %v3872_v12, %v643_v24 }
  0xf4   : > { %670 = vst [vmem:[#allocation2 + $0x90] ss:$-60 sps:$4 sm:$0x83] %v655_v25   ;;  %v645_v3 = vpop.permute.xlu1 %644 }
  0xf5   : > { %v656_v26 = vsel %vm652_vm5, %v643_v24, %v645_v3 }
  0xf6   : > { %671 = vst [vmem:[#allocation2 + $0x98] ss:$-60 sps:$4 sm:$0x83] %v656_v26   ;;  %v647_v27 = vpop.permute.xlu0 %646 }
  0xf7   : > { %v657_v29 = vsel %vm652_vm5, %v645_v3, %v647_v27 }
  0xf8   : > { %672 = vst [vmem:[#allocation2 + $0xa0] ss:$-60 sps:$4 sm:$0x83] %v657_v29   ;;  %v3949_v30 = vpop.permute.xlu1 %648 }
  0xf9   : > { %v658_v32 = vsel %vm652_vm5, %v647_v27, %v3949_v30 }
  0xfa   : > { %673 = vst [vmem:[#allocation2 + $0xa8] ss:$-60 sps:$4 sm:$0x83] %v658_v32   ;;  %v701_v33 = vpop.permute.xlu0 %700 }
  0xfb   : > { %v713_v34 = vsel %vm710_vm6, %v3881_v28, %v701_v33  ;;  %v834_v35 = vld [vmem:[#allocation2 + $0x50] sm:$0xff] }
  0xfc   : > { %728 = vst [vmem:[#allocation2 + $0x90] sm:$0x1c] %v713_v34  ;;  %v703_v12 = vpop.permute.xlu1 %702  ;;  %v3039_v44 = vpack.c.bf16 %v834_v35, %v826_v42 }
  0xfd   : > { %v714_v36 = vsel %vm710_vm6, %v701_v33, %v703_v12  ;;  %v835_v39 = vld [vmem:[#allocation2 + $0x58] sm:$0xff] }
  0xfe   : > { %729 = vst [vmem:[#allocation2 + $0x98] sm:$0x1c] %v714_v36  ;;  %v705_v40 = vpop.permute.xlu0 %704  ;;  %v3037_v41 = vpack.c.bf16 %v835_v39, %v827_v38 }
  0xff   : > { %v715_v43 = vsel %vm710_vm6, %v703_v12, %v705_v40  ;;  %v836_v47 = vld [vmem:[#allocation2 + $0x60] sm:$0xff] }
 0x100   : > { %730 = vst [vmem:[#allocation2 + $0xa0] sm:$0x1c] %v715_v43  ;;  %v3957_v45 = vpop.permute.xlu1 %706  ;;  %3038 = vmatprep.subr.bf16.mxu1 %v3037_v41  ;;  %v3049_v55 = vpack.c.bf16 %v836_v47, %v828_v53 }
 0x101   : > { %v716_v28 = vsel %vm710_vm6, %v705_v40, %v3957_v45  ;;  %3040 = vmatpush1.bf16.msra.mxu1 %v3039_v44  ;;  %v837_v49 = vld [vmem:[#allocation2 + $0x68] sm:$0xff] }
 0x102   : > { %731 = vst [vmem:[#allocation2 + $0xa8] sm:$0x1c] %v716_v28  ;;  %v750_v51 = vpop.permute.xlu0 %749  ;;  %v3047_v52 = vpack.c.bf16 %v837_v49, %v829_v48 }
 0x103   : > { %v762_v54 = vsel %vm759_vm7, %v3885_v31, %v750_v51 }
 0x104   : > { %777 = vst [vmem:[#allocation2 + $0x90] sm:$0xe0] %v762_v54  ;;  %v752_v57 = vpop.permute.xlu1 %751  ;;  %3048 = vmatprep.subr.bf16.mxu0 %v3047_v52 }
 0x105   : > { %v763_v58 = vsel %vm759_vm7, %v750_v51, %v752_v57  ;;  %3050 = vmatpush1.bf16.msra.mxu0 %v3049_v55 }
 0x106   : > { %778 = vst [vmem:[#allocation2 + $0x98] sm:$0xe0] %v763_v58  ;;  %v754_v60 = vpop.permute.xlu0 %753 }
 0x107   : > { %v764_v61 = vsel %vm759_vm7, %v752_v57, %v754_v60 }
 0x108   : > { %779 = vst [vmem:[#allocation2 + $0xa0] sm:$0xe0] %v764_v61  ;;  %v3965_v62 = vpop.permute.xlu1 %755 }
 0x109   : > { %v765_v0 = vsel %vm759_vm7, %v754_v60, %v3965_v62 }
 0x10a   : > { %780 = vst [vmem:[#allocation2 + $0xa8] sm:$0xe0] %v765_v0  ;;  %v791_v1 = vpop.permute.xlu0 %790 }
 0x10b   : > { %v803_v31 = vsel %vm800_vm8, %v3889_v37, %v791_v1  ;;  %v842_v19 = vld [vmem:[#allocation2 + $0x90] sm:$0xff] }
 0x10c   : > { %818 = vst [vmem:[#allocation2 + $0xd0] sm:$0x7] %v803_v31  ;;  %v793_v4 = vpop.permute.xlu1 %792 }
 0x10d   : > { %v804_v5 = vsel %vm800_vm8, %v791_v1, %v793_v4  ;;  %v843_v16 = vld [vmem:[#allocation2 + $0x98] sm:$0xff] }
 0x10e   : > { %819 = vst [vmem:[#allocation2 + $0xd8] sm:$0x7] %v804_v5  ;;  %v795_v6 = vpop.permute.xlu0 %794  ;;  %v1345_v5 = vld [vmem:[#allocation3 + $0x218] sm:$0xff] }
 0x10f   : > { %v805_v7 = vsel %vm800_vm8, %v793_v4, %v795_v6  ;;  %v844_v26 = vld [vmem:[#allocation2 + $0xa0] sm:$0xff]  ;;  %v1343_v4 = vld [vmem:[#allocation3 + $0x208] sm:$0xff] }
 0x110   : > { %820 = vst [vmem:[#allocation2 + $0xe0] sm:$0x7] %v805_v7  ;;  %v3973_v8 = vpop.permute.xlu1 %796  ;;  %v3131_v7 = vpack.c.bf16 %v1345_v5, %v1343_v4  ;;  %v1374_v5 = vld [vmem:[#allocation3 + $0x300] sm:$0xff] }
 0x111   : > { %v806_v9 = vsel %vm800_vm8, %v795_v6, %v3973_v8  ;;  %v845_v24 = vld [vmem:[#allocation2 + $0xa8] sm:$0xff]  ;;  %v1342_v6 = vld [vmem:[#allocation3 + $0x200] sm:$0xff] }
 0x112   : > { %821 = vst [vmem:[#allocation2 + $0xe8] sm:$0x7] %v806_v9  ;;  %v450_v10 = vpop.permute.xlu0 %449  ;;  %v1347_v9 = vld [vmem:[#allocation3 + $0x228] sm:$0xff] }
 0x113   : > { %v458_v37 = vsel %vm451_vm1, %v3907_v56, %v450_v10  ;;  %475 = vst.msk [vmem:[#allocation2 + $0x38] sm:$0x38] %vm474_vm13, %v450_v10  ;;  %v850_v13 = vld [vmem:[#allocation2 + $0xd0] sm:$0x7]  ;;  %vm675_vm13 = vcmask 506887   ;;  %v1349_v10 = vld [vmem:[#allocation3 + $0x238] sm:$0xff] }
 0x114   : > { %473 = vst [vmem:[#allocation2 + $0x30] sm:$0x38] %v458_v37  ;;  %v499_v11 = vpop.permute.xlu1 %498  ;;  %v3044_v20 = vpack.c.bf16 %v850_v13, %v842_v19  ;;  %v3135_v13 = vpack.c.bf16 %v1349_v10, %v1347_v9 }
 0x115   : > { %v507_v14 = vsel %vm500_vm4, %v3924_v59, %v499_v11  ;;  %524 = vst.msk [vmem:[#allocation2 + $0x38] sm:$0xc0] %vm523_vm14, %v499_v11  ;;  %v851_v17 = vld [vmem:[#allocation2 + $0xd8] sm:$0x7]  ;;  %vm684_vm14 = vcmask 500736  }
 0x116   : > { %533 = vst.msk [vmem:[#allocation2 + $0x78] sm:$0x1] %vm532_vm15, %v499_v11  ;;  %522 = vst [vmem:[#allocation2 + $0x70] ss:$-60 sps:$4 sm:$0xc1] %v507_v14   ;;  %v557_v18 = vpop.permute.xlu0 %556  ;;  %v3041_v63 = vpack.c.bf16 %v851_v17, %v843_v16  ;;  %vm733_vm15 = vcmask 503810  }
 0x117   : > { %v565_v56 = vsel %vm558_vm3, %v3933_v15, %v557_v18  ;;  %582 = vst.msk [vmem:[#allocation2 + $0x78] sm:$0xe] %vm581_vm9, %v557_v18  ;;  %v852_v59 = vld [vmem:[#allocation2 + $0xe0] sm:$0x7]  ;;  %v1348_v16 = vld [vmem:[#allocation3 + $0x230] sm:$0xff]  ;;  %v1351_v17 = vld [vmem:[#allocation3 + $0x248] sm:$0xff] }
 0x118   : > { %580 = vst [vmem:[#allocation2 + $0x70] sm:$0xe] %v565_v56  ;;  %v602_v21 = vpop.permute.xlu1 %601  ;;  %3043 = vmatprep.subr.msk.bf16.mxu1 %vm3899_vm11, %v3041_v63  ;;  %v3054_v29 = vpack.c.bf16 %v852_v59, %v844_v26  ;;  %v1346_v14 = vld [vmem:[#allocation3 + $0x220] sm:$0xff]  ;;  %v1353_v63 = vld [vmem:[#allocation3 + $0x258] sm:$0xff]  ;;  %v1355_v59 = vld [vmem:[#allocation3 + $0x268] sm:$0xff]  ;;  %vm1843_vm9 = vcmask 924672  }
 0x119   : > { %v610_v23 = vsel %vm603_vm2, %v3941_v22, %v602_v21  ;;  %627 = vst.msk [vmem:[#allocation2 + $0x78] sm:$0x70] %vm626_vm10, %v602_v21  ;;  %3046 = vmatpush1.bf16.msk.msra.mxu1 %vm3899_vm11, %v3044_v20  ;;  %v853_v25 = vld [vmem:[#allocation2 + $0xe8] sm:$0x7]  ;;  %vm782_vm2 = vcmask 506885   ;;  %v3137_v19 = vpack.c.bf16 %v1348_v16, %v1346_v14  ;;  %v3139_v56 = vpack.c.bf16 %v1353_v63, %v1351_v17  ;;  %v1350_v20 = vld [vmem:[#allocation3 + $0x240] sm:$0xff] }
 0x11a   : > { %625 = vst [vmem:[#allocation2 + $0x70] sm:$0x70] %v610_v23  ;;  %v651_v15 = vpop.permute.xlu0 %650  ;;  %v3051_v3 = vpack.c.bf16 %v853_v25, %v845_v24  ;;  %v1352_v21 = vld [vmem:[#allocation3 + $0x250] sm:$0xff]  ;;  %v1357_v23 = vld [vmem:[#allocation3 + $0x278] sm:$0xff]  ;;  %v1359_v26 = vld [vmem:[#allocation3 + $0x288] sm:$0xff]  ;;  %vm1820_vm10 = vcmask 531461  }
 0x11b   : > { %v659_v27 = vsel %vm652_vm5, %v3949_v30, %v651_v15  ;;  %676 = vst.msk [vmem:[#allocation2 + $0x78] sm:$0x80] %vm675_vm13, %v651_v15  ;;  %v3141_v24 = vpack.c.bf16 %v1352_v21, %v1350_v20  ;;  %v3143_v25 = vpack.c.bf16 %v1357_v23, %v1355_v59  ;;  %v1383_v14 = vld [vmem:[#allocation3 + $0x348] sm:$0xff]  ;;  %v1385_v16 = vld [vmem:[#allocation3 + $0x358] sm:$0xff]  ;;  %vm1514_vm5 = vcmask 1044480  }
 0x11c   : > { %685 = vst.msk [vmem:[#allocation2 + $0xb8] sm:$0x3] %vm684_vm14, %v651_v15  ;;  %674 = vst [vmem:[#allocation2 + $0xb0] ss:$-60 sps:$4 sm:$0x83] %v659_v27   ;;  %v709_v32 = vpop.permute.xlu1 %708  ;;  %3053 = vmatprep.subr.msk.bf16.mxu0 %vm3899_vm11, %v3051_v3  ;;  %2900 = vmatmul.mubr.msk.f32.vlgmr.msra.gmra.mrb[0].mxu1 %vm863_vm12, %v3918_v2  ;;  %v831_v12 = vld [vmem:[#allocation2 + $0x38] sm:$0xff]  ;;  %v3171_v63 = vpack.c.bf16 %v1385_v16, %v1383_v14 }
 0x11d   : > { %v717_v22 = vsel %vm710_vm6, %v3957_v45, %v709_v32  ;;  %734 = vst.msk [vmem:[#allocation2 + $0xb8] sm:$0x1c] %vm733_vm15, %v709_v32  ;;  %3056 = vmatpush1.bf16.msk.msra.mxu0 %vm3899_vm11, %v3054_v29  ;;  %1169 = vmatprep.mubr.f32.mxu1 %v3578_v46  ;;  %v830_v39 = vld [vmem:[#allocation2 + $0x30] sm:$0xff]  ;;  %v1354_v15 = vld [vmem:[#allocation3 + $0x260] sm:$0xff]  ;;  %v1361_v27 = vld [vmem:[#allocation3 + $0x298] sm:$0xff]  ;;  %vm4489_vm6 = vmmov 1  }
 0x11e   : > { %732 = vst [vmem:[#allocation2 + $0xb0] sm:$0x1c] %v717_v22  ;;  %v758_v30 = vpop.permute.xlu0 %757  ;;  %3132 = vmatprep.subr.bf16.mxu0 %v3131_v7  ;;  %v1356_v3 = vld [vmem:[#allocation3 + $0x270] sm:$0xff]  ;;  %v3147_v32 = vpack.c.bf16 %v1361_v27, %v1359_v26  ;;  %v1358_v22 = vld [vmem:[#allocation3 + $0x280] sm:$0xff]  ;;  %v1379_v7 = vld [vmem:[#allocation3 + $0x328] sm:$0xff]  ;;  %vm1848_vm13 = vcmask 531463  }
 0x11f   : > { %v766_v33 = vsel %vm759_vm7, %v3965_v62, %v758_v30  ;;  %783 = vst.msk [vmem:[#allocation2 + $0xb8] sm:$0xe0] %vm782_vm2, %v758_v30  ;;  %v3145_v29 = vpack.c.bf16 %v1356_v3, %v1354_v15  ;;  %v1360_v30 = vld [vmem:[#allocation3 + $0x290] sm:$0xff]  ;;  %v1387_v20 = vld [vmem:[#allocation3 + $0x368] sm:$0xff]  ;;  %v1389_v21 = vld [vmem:[#allocation3 + $0x378] sm:$0xff]  ;;  %vm1851_vm14 = vcmask 527360  }
 0x120   : > { %781 = vst [vmem:[#allocation2 + $0xb0] sm:$0xe0] %v766_v33  ;;  %v799_v34 = vpop.permute.xlu1 %798  ;;  %2903 = vmatmul.mubr.msk.f32.vlgmr.msra.gmra.mrb[2].mxu0 %vm863_vm12, %v3918_v2  ;;  %v1363_v33 = vld [vmem:[#allocation3 + $0x2a8] sm:$0xff]  ;;  %v3175_v23 = vpack.c.bf16 %v1389_v21, %v1387_v20  ;;  %v1393_v3 = vld [vmem:[#allocation3 + $0x398] sm:$0xff]  ;;  %vm4180_vm7 = vmpackc.low %vm1514_vm5, %vm4489_vm6  ;;  %vm1859_vm15 = vcmask 916480   ;;  %vm1864_vm2 = vcmask 531460  }
 0x121   : > { %v807_v35 = vsel %vm800_vm8, %v3973_v8, %v799_v34  ;;  %823 = vst.msk [vmem:[#allocation2 + $0xf8] sm:$0x7] %vm425_vm0, %v799_v34  ;;  %v1344_v8 = vld [vmem:[#allocation3 + $0x210] sm:$0xff]  ;;  %v1365_v34 = vld [vmem:[#allocation3 + $0x2b8] sm:$0xff]  ;;  %v1391_v15 = vld [vmem:[#allocation3 + $0x388] sm:$0xff]  ;;  %vm1510_vm0 = vcmask 236544  }
 0x122   : > { %822 = vst [vmem:[#allocation2 + $0xf0] sm:$0x7] %v807_v35  ;;  %v839_v36 = vld [vmem:[#allocation2 + $0x78] sm:$0xff]  ;;  %v3133_v11 = vpack.c.bf16 %v1344_v8, %v1342_v6  ;;  %v3151_v35 = vpack.c.bf16 %v1365_v34, %v1363_v33  ;;  %v1376_v6 = vld [vmem:[#allocation3 + $0x310] sm:$0xff]  ;;  %v3179_v27 = vpack.c.bf16 %v1393_v3, %v1391_v15  ;;  %v1283_v21 = vld [vmem:[#allocation3 + $0x28] sm:$0xff]  ;;  %vm1806_vm8 = vcmask 528384  }
 0x123   : > { %v3057_v38 = vpack.c.bf16 %v839_v36, %v831_v12  ;;  %v838_v40 = vld [vmem:[#allocation2 + $0x70] sm:$0xff]  ;;  %v3149_v12 = vpack.c.bf16 %v1360_v30, %v1358_v22  ;;  %v1362_v36 = vld [vmem:[#allocation3 + $0x2a0] sm:$0xff]  ;;  %v1381_v8 = vld [vmem:[#allocation3 + $0x338] sm:$0xff]  ;;  %v3165_v9 = vpack.c.bf16 %v1376_v6, %v1374_v5  ;;  %vm1880_vm5 = vcmask 529409  }
 0x124   : > { %v3059_v41 = vpack.c.bf16 %v838_v40, %v830_v39  ;;  %3134 = vmatpush1.bf16.msra.mxu0 %v3133_v11  ;;  %v1367_v39 = vld [vmem:[#allocation3 + $0x2c8] sm:$0xff]  ;;  %v1369_v40 = vld [vmem:[#allocation3 + $0x2d8] sm:$0xff]  ;;  %v3167_v10 = vpack.c.bf16 %v1381_v8, %v1379_v7  ;;  %v1378_v11 = vld [vmem:[#allocation3 + $0x320] sm:$0xff] }
 0x125   : > { %3058 = vmatprep.subr.bf16.mxu1 %v3057_v38  ;;  %3136 = vmatprep.subr.bf16.mxu0 %v3135_v13  ;;  %v1364_v38 = vld [vmem:[#allocation3 + $0x2b0] sm:$0xff]  ;;  %v1395_v22 = vld [vmem:[#allocation3 + $0x3a8] sm:$0xff]  ;;  %v1397_v30 = vld [vmem:[#allocation3 + $0x3b8] sm:$0xff] }
 0x126   : > { %3060 = vmatpush1.bf16.msra.mxu1 %v3059_v41  ;;  %v847_v42 = vld [vmem:[#allocation2 + $0xb8] sm:$0xff]  ;;  %v3153_v41 = vpack.c.bf16 %v1364_v38, %v1362_v36  ;;  %v1380_v13 = vld [vmem:[#allocation3 + $0x330] sm:$0xff]  ;;  %v3183_v34 = vpack.c.bf16 %v1397_v30, %v1395_v22  ;;  %v1399_v38 = vld [vmem:[#allocation3 + $0x3c8] sm:$0xff] }
 0x127   : > { %v846_v45 = vld [vmem:[#allocation2 + $0xb0] sm:$0xff]  ;;  %v3169_v17 = vpack.c.bf16 %v1380_v13, %v1378_v11  ;;  %v1281_v16 = vld [vmem:[#allocation3 + $0x18] sm:$0xff]  ;;  %v1287_v3 = vld [vmem:[#allocation3 + $0x48] sm:$0xff] }
 0x128   : > { %v855_v43 = vld [vmem:[#allocation2 + $0xf8] sm:$0x7]  ;;  %3138 = vmatpush1.bf16.msra.mxu0 %v3137_v19  ;;  %v1382_v19 = vld [vmem:[#allocation3 + $0x340] sm:$0xff]  ;;  %v1291_v22 = vld [vmem:[#allocation3 + $0x68] sm:$0xff] }
 0x129   : > { %v3061_v44 = vpack.c.bf16 %v855_v43, %v847_v42  ;;  %v854_v47 = vld [vmem:[#allocation2 + $0xf0] sm:$0x7]  ;;  %3140 = vmatprep.subr.bf16.mxu0 %v3139_v56  ;;  %v3155_v42 = vpack.c.bf16 %v1369_v40, %v1367_v39  ;;  %v1366_v43 = vld [vmem:[#allocation3 + $0x2c0] sm:$0xff]  ;;  %v1401_v39 = vld [vmem:[#allocation3 + $0x3d8] sm:$0xff] }
 0x12a   : > { %v3064_v28 = vpack.c.bf16 %v854_v47, %v846_v45  ;;  %v1371_v45 = vld [vmem:[#allocation3 + $0x2e8] sm:$0xff]  ;;  %v1373_v47 = vld [vmem:[#allocation3 + $0x2f8] sm:$0xff]  ;;  %v1384_v56 = vld [vmem:[#allocation3 + $0x350] sm:$0xff]  ;;  %v3187_v40 = vpack.c.bf16 %v1401_v39, %v1399_v38 }
 0x12b   : > { %3063 = vmatprep.subr.msk.bf16.mxu1 %vm3899_vm11, %v3061_v44  ;;  %v1368_v44 = vld [vmem:[#allocation3 + $0x2d0] sm:$0xff]  ;;  %v3173_v59 = vpack.c.bf16 %v1384_v56, %v1382_v19  ;;  %v1297_v38 = vld [vmem:[#allocation3 + $0x98] sm:$0xff] }
 0x12c   : > { %3066 = vmatpush1.bf16.msk.msra.mxu1 %vm3899_vm11, %v3064_v28  ;;  %3142 = vmatpush1.bf16.msra.mxu0 %v3141_v24  ;;  %v3157_v28 = vpack.c.bf16 %v1368_v44, %v1366_v43  ;;  %v1386_v24 = vld [vmem:[#allocation3 + $0x360] sm:$0xff]  ;;  %v1403_v44 = vld [vmem:[#allocation3 + $0x3e8] sm:$0xff]  ;;  %vm1823_vm11 = vcmask 525312  }
 0x12d   : > { %3144 = vmatprep.subr.bf16.mxu0 %v3143_v25  ;;  %v1388_v25 = vld [vmem:[#allocation3 + $0x370] sm:$0xff] }
 0x12e   : > { %v3177_v26 = vpack.c.bf16 %v1388_v25, %v1386_v24  ;;  %v1282_v24 = vld [vmem:[#allocation3 + $0x20] sm:$0xff]  ;;  %v1284_v25 = vld [vmem:[#allocation3 + $0x30] sm:$0xff] }
 0x12f   : > { %2906 = vmatmul.mubr.msk.f32.vlgmr.msra.gmra.mrb[2].mxu1 %vm863_vm12, %v3918_v2  ;;  %v4017_v52 = vpop.permute.xlu0 %860  ;;  %v3073_v15 = vpack.c.bf16 %v1284_v25, %v1282_v24  ;;  %v1314_v25 = vld [vmem:[#allocation3 + $0x120] sm:$0xff]  ;;  %vm1835_vm12 = vcmask 530434  }
 0x130   : > { %3146 = vmatpush1.bf16.msra.mxu0 %v3145_v29  ;;  %v1390_v29 = vld [vmem:[#allocation3 + $0x380] sm:$0xff] }
 0x131   : > { %3148 = vmatprep.subr.bf16.mxu0 %v3147_v32  ;;  %v1392_v32 = vld [vmem:[#allocation3 + $0x390] sm:$0xff] }
 0x132   : > { %v3181_v33 = vpack.c.bf16 %v1392_v32, %v1390_v29  ;;  %v1288_v32 = vld [vmem:[#allocation3 + $0x50] sm:$0xff] }
 0x134   : > { %3150 = vmatpush1.bf16.msra.mxu0 %v3149_v12  ;;  %v1394_v12 = vld [vmem:[#allocation3 + $0x3a0] sm:$0xff] }
 0x135   : > { %3152 = vmatprep.subr.bf16.mxu0 %v3151_v35  ;;  %v1396_v35 = vld [vmem:[#allocation3 + $0x3b0] sm:$0xff] }
 0x136   : > { %v3185_v36 = vpack.c.bf16 %v1396_v35, %v1394_v12  ;;  %v1290_v12 = vld [vmem:[#allocation3 + $0x60] sm:$0xff]  ;;  %v1292_v35 = vld [vmem:[#allocation3 + $0x70] sm:$0xff] }
 0x137   : > { %v3081_v39 = vpack.c.bf16 %v1292_v35, %v1290_v12  ;;  %v1322_v35 = vld [vmem:[#allocation3 + $0x160] sm:$0xff] }
 0x138   : > { %3154 = vmatpush1.bf16.msra.mxu0 %v3153_v41  ;;  %v1398_v41 = vld [vmem:[#allocation3 + $0x3c0] sm:$0xff] }
 0x139   : > { %3156 = vmatprep.subr.bf16.mxu0 %v3155_v42  ;;  %v1400_v42 = vld [vmem:[#allocation3 + $0x3d0] sm:$0xff] }
 0x13a   : > { %v3189_v43 = vpack.c.bf16 %v1400_v42, %v1398_v41  ;;  %v1294_v41 = vld [vmem:[#allocation3 + $0x80] sm:$0xff]  ;;  %v1296_v42 = vld [vmem:[#allocation3 + $0x90] sm:$0xff] }
 0x13c   : > { %3158 = vmatpush1.bf16.msra.mxu0 %v3157_v28  ;;  %v1402_v28 = vld [vmem:[#allocation3 + $0x3e0] sm:$0xff] }
 0x1b2   : > { %v4013_v48 = vpop.f32.mrb[0].mxu0 }
 0x1b3   : > { %v4015_v49 = vpop.f32.mrb[1].mxu0  ;;  %v4078_v14 = vadd.f32 %v4013_v48, %v4017_v52 }
 0x1b5   : > { %v1176_v48 = vmax.f32 %v4078_v14, 0.0  ;;  %v1425_v14 = vld [vmem:[#allocation3 + $0x498] sm:$0xff] }
 0x1ef   : > { %v1029_v51 = vpop.f32.mrb[0].mxu1 }
 0x1f0   : > { %v1031_v53 = vpop.f32.mrb[1].mxu1  ;;  %v4030_v60 = vadd.f32 %v1029_v51, %v4017_v52  ;;  %v3159_v51 = vpack.c.bf16 %v1373_v47, %v1371_v45  ;;  %v1405_v45 = vld [vmem:[#allocation3 + $0x3f8] sm:$0xff] }
 0x1f1   : > { %v4020_v54 = vadd.f32 %v1031_v53, %v4017_v52  ;;  %v1370_v53 = vld [vmem:[#allocation3 + $0x2e0] sm:$0xff]  ;;  %v3191_v47 = vpack.c.bf16 %v1405_v45, %v1403_v44  ;;  %v1301_v44 = vld [vmem:[#allocation3 + $0xb8] sm:$0xff]  ;;  %v3085_v45 = vpack.c.bf16 %v1296_v42, %v1294_v41 }
 0x1f2   : > { %v1178_v1 = vmax.f32 %v4030_v60, 0.0  ;;  %3160 = vmatprep.subr.bf16.mxu0 %v3159_v51  ;;  %v1404_v51 = vld [vmem:[#allocation3 + $0x3f0] sm:$0xff]  ;;  %v1326_v42 = vld [vmem:[#allocation3 + $0x180] sm:$0xff] }
 0x1f3   : > { %v1100_v55 = vpop.f32.mrb[2].mxu0  ;;  %v1179_v57 = vmax.f32 %v4020_v54, 0.0 }
 0x1f4   : > { %v4024_v50 = vadd.f32 %v1100_v55, %v4017_v52  ;;  %v1102_v58 = vpop.f32.mrb[3].mxu0  ;;  %v1372_v55 = vld [vmem:[#allocation3 + $0x2f0] sm:$0xff] }
 0x1f5   : > { %v4027_v2 = vadd.f32 %v1102_v58, %v4017_v52  ;;  %v1375_v58 = vld [vmem:[#allocation3 + $0x308] sm:$0xff] }
 0x1f6   : > { %v1180_v61 = vmax.f32 %v4024_v50, 0.0 }
 0x1f7   : > { %v1181_v0 = vmax.f32 %v4027_v2, 0.0 }
 0x1f8   : > { %v3457_v62 = vpack.i.bf16 %v1180_v61, %v1179_v57 }
 0x1f9   : > { %v3462_v31 = vpack.i.bf16 %v1178_v1, %v1181_v0 }
 0x1fa   : > { %3458 = vrot.lane.b32.xlu1 %v3457_v62, %s3572_s24  ;;  %v1377_v62 = vld [vmem:[#allocation3 + $0x318] sm:$0xff] }
 0x1fb   : > { %v3163_v4 = vpack.c.bf16 %v1377_v62, %v1375_v58 }
 0x1fe   : > { %3463 = vrot.lane.b32.xlu1 %v3462_v31, %s3572_s24  ;;  %v3161_v31 = vpack.c.bf16 %v1372_v55, %v1370_v53  ;;  %v3193_v55 = vpack.c.bf16 %v1404_v51, %v1402_v28  ;;  %v1298_v28 = vld [vmem:[#allocation3 + $0xa0] sm:$0xff]  ;;  %v1300_v51 = vld [vmem:[#allocation3 + $0xb0] sm:$0xff] }
 0x200   : > { %3162 = vmatpush1.bf16.msra.mxu0 %v3161_v31 }
 0x201   : > { %3164 = vmatprep.subr.bf16.mxu0 %v3163_v4 }
 0x202   : > { %v4045_v37 = vpop.f32.mrb[2].mxu1 }
 0x203   : > { %v4047_v18 = vpop.f32.mrb[3].mxu1  ;;  %v4086_v60 = vadd.f32 %v4045_v37, %v4017_v52  ;;  %v1279_v37 = vld [vmem:[#allocation3 + $0x8] sm:$0xff] }
 0x204   : > { %3166 = vmatpush1.bf16.msra.mxu0 %v3165_v9  ;;  %v4062_v9 = vadd.f32 %v4047_v18, %v4017_v52  ;;  %v4082_v18 = vadd.f32 %v4015_v49, %v4017_v52  ;;  %v1407_v52 = vld [vmem:[#allocation3 + $0x408] sm:$0xff]  ;;  %v3067_v56 = vpack.c.bf16 %v1281_v16, %v1279_v37  ;;  %v1308_v37 = vld [vmem:[#allocation3 + $0xf0] sm:$0xff] }
 0x205   : > { %3168 = vmatprep.subr.bf16.mxu0 %v3167_v10  ;;  %v1182_v49 = vmax.f32 %v4086_v60, 0.0  ;;  %v1311_v16 = vld [vmem:[#allocation3 + $0x108] sm:$0xff]  ;;  %v1416_v60 = vld [vmem:[#allocation3 + $0x450] sm:$0xff] }
 0x206   : > { %v1177_v50 = vmax.f32 %v4082_v18, 0.0  ;;  %3068 = vmatprep.subr.bf16.mxu1 %v3067_v56  ;;  %v1310_v56 = vld [vmem:[#allocation3 + $0x100] sm:$0xff] }
 0x208   : > { %3170 = vmatpush1.bf16.msra.mxu0 %v3169_v17  ;;  %v1278_v17 = vld [vmem:[#allocation3] sm:$0xff]  ;;  %v3472_v19 = vpack.i.bf16 %v1176_v48, %v1177_v50 }
 0x209   : > { %3172 = vmatprep.subr.bf16.mxu0 %v3171_v63  ;;  %v1280_v63 = vld [vmem:[#allocation3 + $0x10] sm:$0xff] }
 0x20a   : > { %v3069_v20 = vpack.c.bf16 %v1280_v63, %v1278_v17  ;;  %v1313_v17 = vld [vmem:[#allocation3 + $0x118] sm:$0xff] }
 0x20c   : > { %3174 = vmatpush1.bf16.msra.mxu0 %v3173_v59  ;;  %v1285_v59 = vld [vmem:[#allocation3 + $0x38] sm:$0xff]  ;;  %3070 = vmatpush1.bf16.msra.mxu1 %v3069_v20  ;;  %v1312_v20 = vld [vmem:[#allocation3 + $0x110] sm:$0xff] }
 0x20d   : > { %3176 = vmatprep.subr.bf16.mxu0 %v3175_v23  ;;  %v3071_v23 = vpack.c.bf16 %v1285_v59, %v1283_v21  ;;  %v1315_v21 = vld [vmem:[#allocation3 + $0x128] sm:$0xff]  ;;  %v1317_v59 = vld [vmem:[#allocation3 + $0x138] sm:$0xff] }
 0x20e   : > { %v3103_v24 = vpack.c.bf16 %v1317_v59, %v1315_v21  ;;  %v1339_v21 = vld [vmem:[#allocation3 + $0x1e8] sm:$0xff]  ;;  %v1341_v59 = vld [vmem:[#allocation3 + $0x1f8] sm:$0xff] }
 0x20f   : > { %3072 = vmatprep.subr.bf16.mxu1 %v3071_v23  ;;  %v3101_v23 = vpack.c.bf16 %v1312_v20, %v1310_v56 }
 0x210   : > { %3178 = vmatpush1.bf16.msra.mxu0 %v3177_v26  ;;  %v1289_v26 = vld [vmem:[#allocation3 + $0x58] sm:$0xff]  ;;  %3074 = vmatpush1.bf16.msra.mxu1 %v3073_v15  ;;  %v1316_v15 = vld [vmem:[#allocation3 + $0x130] sm:$0xff] }
 0x211   : > { %3180 = vmatprep.subr.bf16.mxu0 %v3179_v27  ;;  %v1286_v27 = vld [vmem:[#allocation3 + $0x40] sm:$0xff]  ;;  %v3075_v29 = vpack.c.bf16 %v1289_v26, %v1287_v3  ;;  %v1319_v3 = vld [vmem:[#allocation3 + $0x148] sm:$0xff]  ;;  %v1321_v26 = vld [vmem:[#allocation3 + $0x158] sm:$0xff] }
 0x212   : > { %v3077_v30 = vpack.c.bf16 %v1288_v32, %v1286_v27  ;;  %v3105_v27 = vpack.c.bf16 %v1316_v15, %v1314_v25  ;;  %v1318_v32 = vld [vmem:[#allocation3 + $0x140] sm:$0xff] }
 0x213   : > { %3076 = vmatprep.subr.bf16.mxu1 %v3075_v29  ;;  %v3107_v29 = vpack.c.bf16 %v1321_v26, %v1319_v3  ;;  %v3127_v26 = vpack.c.bf16 %v1341_v59, %v1339_v21  ;;  %v1437_v21 = vld [vmem:[#allocation3 + $0x4f8] sm:$0xff] }
 0x214   : > { %3182 = vmatpush1.bf16.msra.mxu0 %v3181_v33  ;;  %v1293_v33 = vld [vmem:[#allocation3 + $0x78] sm:$0xff]  ;;  %3078 = vmatpush1.bf16.msra.mxu1 %v3077_v30  ;;  %v1323_v30 = vld [vmem:[#allocation3 + $0x168] sm:$0xff] }
 0x215   : > { %3184 = vmatprep.subr.bf16.mxu0 %v3183_v34  ;;  %v3079_v34 = vpack.c.bf16 %v1293_v33, %v1291_v22  ;;  %v1320_v22 = vld [vmem:[#allocation3 + $0x150] sm:$0xff]  ;;  %v1325_v33 = vld [vmem:[#allocation3 + $0x178] sm:$0xff] }
 0x216   : > { %v3111_v12 = vpack.c.bf16 %v1325_v33, %v1323_v30  ;;  %v1410_v33 = vld [vmem:[#allocation3 + $0x420] sm:$0xff] }
 0x217   : > { %3080 = vmatprep.subr.bf16.mxu1 %v3079_v34  ;;  %v3109_v34 = vpack.c.bf16 %v1320_v22, %v1318_v32 }
 0x218   : > { %3186 = vmatpush1.bf16.msra.mxu0 %v3185_v36  ;;  %v1295_v36 = vld [vmem:[#allocation3 + $0x88] sm:$0xff]  ;;  %3082 = vmatpush1.bf16.msra.mxu1 %v3081_v39  ;;  %v1329_v39 = vld [vmem:[#allocation3 + $0x198] sm:$0xff] }
 0x219   : > { %3188 = vmatprep.subr.bf16.mxu0 %v3187_v40  ;;  %v3083_v40 = vpack.c.bf16 %v1297_v38, %v1295_v36  ;;  %v1324_v36 = vld [vmem:[#allocation3 + $0x170] sm:$0xff]  ;;  %v1327_v38 = vld [vmem:[#allocation3 + $0x188] sm:$0xff] }
 0x21a   : > { %v3115_v41 = vpack.c.bf16 %v1329_v39, %v1327_v38 }
 0x21b   : > { %3084 = vmatprep.subr.bf16.mxu1 %v3083_v40  ;;  %v3113_v40 = vpack.c.bf16 %v1324_v36, %v1322_v35  ;;  %v1415_v35 = vld [vmem:[#allocation3 + $0x448] sm:$0xff]  ;;  %v1417_v36 = vld [vmem:[#allocation3 + $0x458] sm:$0xff] }
 0x21c   : > { %3190 = vmatpush1.bf16.msra.mxu0 %v3189_v43  ;;  %v1299_v43 = vld [vmem:[#allocation3 + $0xa8] sm:$0xff]  ;;  %3086 = vmatpush1.bf16.msra.mxu1 %v3085_v45 }
 0x21d   : > { %3192 = vmatprep.subr.bf16.mxu0 %v3191_v47  ;;  %v3087_v47 = vpack.c.bf16 %v1301_v44, %v1299_v43  ;;  %v1328_v43 = vld [vmem:[#allocation3 + $0x190] sm:$0xff]  ;;  %v1331_v45 = vld [vmem:[#allocation3 + $0x1a8] sm:$0xff] }
 0x21e   : > { %v3117_v44 = vpack.c.bf16 %v1328_v43, %v1326_v42  ;;  %v1421_v42 = vld [vmem:[#allocation3 + $0x478] sm:$0xff] }
 0x21f   : > { %3088 = vmatprep.subr.bf16.mxu1 %v3087_v47  ;;  %v1333_v47 = vld [vmem:[#allocation3 + $0x1b8] sm:$0xff] }
 0x220   : > { %3194 = vmatpush1.bf16.msra.mxu0 %v3193_v55  ;;  %v1305_v55 = vld [vmem:[#allocation3 + $0xd8] sm:$0xff] }
 0x26c   : > { %v3459_v53 = vpop.permute.xlu1 %3458 }
 0x26d   : > { %v3461_v58 = vunpack.i.h.bf16 %v3459_v53  ;;  %v3460_v62 = vunpack.i.l.bf16 %v3459_v53  ;;  %v1303_v53 = vld [vmem:[#allocation3 + $0xc8] sm:$0xff] }
 0x26f   : > { %v1211_v4 = vsel %vm451_vm1, %v3460_v62, %v3461_v58 }
 0x270   : > { %v4049_v31 = vpop.permute.xlu1 %3463  ;;  %v4070_v11 = vmax.f32 %v1179_v57, %v1211_v4  ;;  %v1183_v57 = vmax.f32 %v4062_v9, 0.0  ;;  %v1302_v4 = vld [vmem:[#allocation3 + $0xc0] sm:$0xff]  ;;  %v1423_v9 = vld [vmem:[#allocation3 + $0x488] sm:$0xff] }
 0x271   : > { %v3466_v5 = vunpack.i.h.bf16 %v4049_v31  ;;  %v3465_v6 = vunpack.i.l.bf16 %v4049_v31  ;;  %v1420_v31 = vld [vmem:[#allocation3 + $0x470] sm:$0xff] }
 0x273   : > { %v1212_v7 = vsel %vm451_vm1, %v3461_v58, %v3465_v6  ;;  %v1210_v8 = vsel %vm451_vm1, %v3466_v5, %v3460_v62  ;;  %v3089_v58 = vpack.c.bf16 %v1300_v51, %v1298_v28  ;;  %v3091_v62 = vpack.c.bf16 %v1305_v55, %v1303_v53  ;;  %v1330_v51 = vld [vmem:[#allocation3 + $0x1a0] sm:$0xff]  ;;  %v1332_v53 = vld [vmem:[#allocation3 + $0x1b0] sm:$0xff] }
 0x274   : > { %v4066_v10 = vmax.f32 %v1178_v1, %v1210_v8  ;;  %v4074_v13 = vmax.f32 %v1180_v61, %v1212_v7  ;;  %v1409_v61 = vld [vmem:[#allocation3 + $0x418] sm:$0xff]  ;;  %v1304_v7 = vld [vmem:[#allocation3 + $0xd0] sm:$0xff]  ;;  %v1307_v8 = vld [vmem:[#allocation3 + $0xe8] sm:$0xff]  ;;  %v3119_v28 = vpack.c.bf16 %v1333_v47, %v1331_v45  ;;  %v3121_v55 = vpack.c.bf16 %v1332_v53, %v1330_v51 }
 0x275   : > { %v3195_v1 = vpack.c.bf16 %v1409_v61, %v1407_v52  ;;  %3090 = vmatpush1.bf16.msra.mxu1 %v3089_v58  ;;  %v3093_v52 = vpack.c.bf16 %v1304_v7, %v1302_v4  ;;  %v1337_v4 = vld [vmem:[#allocation3 + $0x1d8] sm:$0xff] }
 0x276   : > { %1243 = vrot.lane.b32.xlu1 %v4066_v10, %s3573_s25  ;;  %v3467_v54 = vpack.i.bf16 %v4074_v13, %v4070_v11  ;;  %3092 = vmatprep.subr.bf16.mxu1 %v3091_v62  ;;  %v1335_v62 = vld [vmem:[#allocation3 + $0x1c8] sm:$0xff] }
 0x277   : > { %3196 = vmatprep.subr.bf16.mxu0 %v3195_v1  ;;  %v1306_v1 = vld [vmem:[#allocation3 + $0xe0] sm:$0xff]  ;;  %v3123_v7 = vpack.c.bf16 %v1337_v4, %v1335_v62  ;;  %v1427_v62 = vld [vmem:[#allocation3 + $0x4a8] sm:$0xff]  ;;  %v1429_v4 = vld [vmem:[#allocation3 + $0x4b8] sm:$0xff] }
 0x278   : > { %3468 = vrot.lane.b32.xlu0 %v3467_v54, %s3573_s25  ;;  %v1309_v54 = vld [vmem:[#allocation3 + $0xf8] sm:$0xff]  ;;  %v3097_v63 = vpack.c.bf16 %v1308_v37, %v1306_v1 }
 0x279   : > { %v3095_v61 = vpack.c.bf16 %v1309_v54, %v1307_v8  ;;  %3094 = vmatpush1.bf16.msra.mxu1 %v3093_v52  ;;  %v1334_v8 = vld [vmem:[#allocation3 + $0x1c0] sm:$0xff]  ;;  %v1336_v54 = vld [vmem:[#allocation3 + $0x1d0] sm:$0xff] }
 0x27a   : > { %1206 = vrot.lane.b32.xlu1 %v1183_v57, %s3572_s24 }
 0x27b   : > { %3096 = vmatprep.subr.bf16.mxu1 %v3095_v61  ;;  %v3125_v61 = vpack.c.bf16 %v1336_v54, %v1334_v8  ;;  %v3215_v8 = vpack.c.bf16 %v1429_v4, %v1427_v62  ;;  %v1426_v54 = vld [vmem:[#allocation3 + $0x4a0] sm:$0xff]  ;;  %v1463_v62 = vld [vmem:[#allocation3 + $0x5c8] sm:$0xff]  ;;  %v1465_v4 = vld [vmem:[#allocation3 + $0x5d8] sm:$0xff] }
 0x27c   : > { %1204 = vrot.lane.b32.xlu0 %v1182_v49, %s3572_s24 }
 0x27d   : > { %3098 = vmatpush1.bf16.msra.mxu1 %v3097_v63  ;;  %v1411_v63 = vld [vmem:[#allocation3 + $0x428] sm:$0xff] }
 0x280   : > { %3473 = vrot.lane.b32.xlu0 %v3472_v19, %s3572_s24  ;;  %v3099_v19 = vpack.c.bf16 %v1313_v17, %v1311_v16  ;;  %v1406_v16 = vld [vmem:[#allocation3 + $0x400] sm:$0xff]  ;;  %v1408_v17 = vld [vmem:[#allocation3 + $0x410] sm:$0xff] }
 0x281   : > { %v3197_v3 = vpack.c.bf16 %v1408_v17, %v1406_v16  ;;  %v1433_v16 = vld [vmem:[#allocation3 + $0x4d8] sm:$0xff] }
 0x282   : > { %3100 = vmatprep.subr.bf16.mxu1 %v3099_v19  ;;  %v1413_v19 = vld [vmem:[#allocation3 + $0x438] sm:$0xff] }
 0x283   : > { %3102 = vmatpush1.bf16.msra.mxu1 %v3101_v23  ;;  %v3199_v30 = vpack.c.bf16 %v1413_v19, %v1411_v63  ;;  %v1430_v19 = vld [vmem:[#allocation3 + $0x4c0] sm:$0xff] }
 0x284   : > { %3104 = vmatprep.subr.bf16.mxu1 %v3103_v24 }
 0x287   : > { %3106 = vmatpush1.bf16.msra.mxu1 %v3105_v27  ;;  %v1338_v27 = vld [vmem:[#allocation3 + $0x1e0] sm:$0xff] }
 0x288   : > { %3108 = vmatprep.subr.bf16.mxu1 %v3107_v29  ;;  %v1340_v29 = vld [vmem:[#allocation3 + $0x1f0] sm:$0xff] }
 0x28b   : > { %3110 = vmatpush1.bf16.msra.mxu1 %v3109_v34  ;;  %v1412_v34 = vld [vmem:[#allocation3 + $0x430] sm:$0xff] }
 0x28c   : > { %3112 = vmatprep.subr.bf16.mxu1 %v3111_v12  ;;  %v3129_v12 = vpack.c.bf16 %v1340_v29, %v1338_v27  ;;  %v3201_v39 = vpack.c.bf16 %v1412_v34, %v1410_v33  ;;  %v1438_v29 = vld [vmem:[#allocation3 + $0x500] sm:$0xff] }
 0x28f   : > { %3114 = vmatpush1.bf16.msra.mxu1 %v3113_v40 }
 0x290   : > { %3116 = vmatprep.subr.bf16.mxu1 %v3115_v41  ;;  %v1414_v41 = vld [vmem:[#allocation3 + $0x440] sm:$0xff] }
 0x291   : > { %v3205_v51 = vpack.c.bf16 %v1416_v60, %v1414_v41  ;;  %v1453_v41 = vld [vmem:[#allocation3 + $0x578] sm:$0xff] }
 0x293   : > { %3118 = vmatpush1.bf16.msra.mxu1 %v3117_v44 }
 0x294   : > { %3120 = vmatprep.subr.bf16.mxu1 %v3119_v28 }
 0x297   : > { %3122 = vmatpush1.bf16.msra.mxu1 %v3121_v55  ;;  %v1418_v55 = vld [vmem:[#allocation3 + $0x460] sm:$0xff] }
 0x298   : > { %3124 = vmatprep.subr.bf16.mxu1 %v3123_v7  ;;  %v3209_v18 = vpack.c.bf16 %v1420_v31, %v1418_v55  ;;  %v1454_v31 = vld [vmem:[#allocation3 + $0x580] sm:$0xff] }
 0x29b   : > { %3126 = vmatpush1.bf16.msra.mxu1 %v3125_v61  ;;  %v1428_v61 = vld [vmem:[#allocation3 + $0x4b0] sm:$0xff] }
 0x29c   : > { %3128 = vmatprep.subr.bf16.mxu1 %v3127_v26  ;;  %v3217_v17 = vpack.c.bf16 %v1428_v61, %v1426_v54  ;;  %v1462_v54 = vld [vmem:[#allocation3 + $0x5c0] sm:$0xff]  ;;  %v1464_v61 = vld [vmem:[#allocation3 + $0x5d0] sm:$0xff] }
 0x29f   : > { %3130 = vmatpush1.bf16.msra.mxu1 %v3129_v12  ;;  %v1442_v12 = vld [vmem:[#allocation3 + $0x520] sm:$0xff] }
 0x2e8   : > { %v4108_v58 = vpop.permute.xlu1 %1243 }
 0x2ea   : > { %v4110_v52 = vpop.permute.xlu0 %3468 }
 0x2eb   : > { %v3471_v1 = vunpack.i.h.bf16 %v4110_v52  ;;  %v3470_v37 = vunpack.i.l.bf16 %v4110_v52  ;;  %v1476_v52 = vld [vmem:[#allocation3 + $0x630] sm:$0xff] }
 0x2ec   : > { %v1207_v24 = vpop.permute.xlu1 %1206 }
 0x2ed   : > { %v1257_v56 = vsel %vm558_vm3, %v4108_v58, %v3470_v37  ;;  %v1258_v20 = vsel %vm558_vm3, %v3470_v37, %v3471_v1  ;;  %v4142_v45 = vmax.f32 %v1183_v57, %v1207_v24  ;;  %v3211_v57 = vpack.c.bf16 %v1425_v14, %v1423_v9  ;;  %v1431_v37 = vld [vmem:[#allocation3 + $0x4c8] sm:$0xff]  ;;  %v1461_v14 = vld [vmem:[#allocation3 + $0x5b8] sm:$0xff] }
 0x2ee   : > { %v1272_v23 = vmax.f32 %v4066_v10, %v1257_v56  ;;  %v1205_v25 = vpop.permute.xlu0 %1204  ;;  %v1273_v15 = vmax.f32 %v4070_v11, %v1258_v20  ;;  %v3219_v63 = vpack.c.bf16 %v1433_v16, %v1431_v37  ;;  %v1432_v56 = vld [vmem:[#allocation3 + $0x4d0] sm:$0xff]  ;;  %v1435_v20 = vld [vmem:[#allocation3 + $0x4e8] sm:$0xff]  ;;  %v1469_v16 = vld [vmem:[#allocation3 + $0x5f8] sm:$0xff] }
 0x2ef   : > { %v1213_v32 = vsel %vm451_vm1, %v3465_v6, %v1205_v25  ;;  %v1214_v22 = vsel %vm451_vm1, %v1205_v25, %v1207_v24  ;;  %v3221_v59 = vpack.c.bf16 %v1432_v56, %v1430_v19  ;;  %v1434_v24 = vld [vmem:[#allocation3 + $0x4e0] sm:$0xff]  ;;  %v1436_v25 = vld [vmem:[#allocation3 + $0x4f0] sm:$0xff]  ;;  %v1459_v9 = vld [vmem:[#allocation3 + $0x5a8] sm:$0xff] }
 0x2f0   : > { %v4127_v10 = vmax.f32 %v1181_v0, %v1213_v32  ;;  %v4131_v11 = vmax.f32 %v1182_v49, %v1214_v22  ;;  %1656 = vmatprep.mubr.f32.mxu0 %v1273_v15  ;;  %v3203_v0 = vpack.c.bf16 %v1417_v36, %v1415_v35  ;;  %v1419_v49 = vld [vmem:[#allocation3 + $0x468] sm:$0xff]  ;;  %v3225_v26 = vpack.c.bf16 %v1436_v25, %v1434_v24  ;;  %v1440_v32 = vld [vmem:[#allocation3 + $0x510] sm:$0xff]  ;;  %v1466_v19 = vld [vmem:[#allocation3 + $0x5e0] sm:$0xff] }
 0x2f1   : > { %1657 = vmatmul.mubr.f32.vlgmr.msra.gmra.mrb[4].mxu0 %v1272_v23  ;;  %v3207_v53 = vpack.c.bf16 %v1421_v42, %v1419_v49  ;;  %v3223_v23 = vpack.c.bf16 %v1437_v21, %v1435_v20  ;;  %v1439_v15 = vld [vmem:[#allocation3 + $0x508] sm:$0xff]  ;;  %v3229_v33 = vpack.c.bf16 %v1440_v32, %v1438_v29  ;;  %v1444_v35 = vld [vmem:[#allocation3 + $0x530] sm:$0xff]  ;;  %v1450_v42 = vld [vmem:[#allocation3 + $0x560] sm:$0xff] }
 0x2f2   : > { %v3474_v6 = vpop.permute.xlu0 %3473  ;;  %v3477_v38 = vpack.i.bf16 %v4131_v11, %v4127_v10  ;;  %3198 = vmatpush1.bf16.msra.mxu0 %v3197_v3  ;;  %v1441_v3 = vld [vmem:[#allocation3 + $0x518] sm:$0xff]  ;;  %v1443_v22 = vld [vmem:[#allocation3 + $0x528] sm:$0xff]  ;;  %v1468_v56 = vld [vmem:[#allocation3 + $0x5f0] sm:$0xff] }
 0x2f3   : > { %v3476_v40 = vunpack.i.h.bf16 %v3474_v6  ;;  %v3475_v2 = vunpack.i.l.bf16 %v3474_v6  ;;  %3200 = vmatprep.subr.bf16.mxu0 %v3199_v30  ;;  %v3227_v27 = vpack.c.bf16 %v1441_v3, %v1439_v15  ;;  %v1445_v30 = vld [vmem:[#allocation3 + $0x538] sm:$0xff]  ;;  %v1447_v36 = vld [vmem:[#allocation3 + $0x548] sm:$0xff]  ;;  %v1470_v3 = vld [vmem:[#allocation3 + $0x600] sm:$0xff] }
 0x2f4   : > { %3478 = vrot.lane.b32.xlu1 %v3477_v38, %s3573_s25  ;;  %v3231_v34 = vpack.c.bf16 %v1445_v30, %v1443_v22  ;;  %v1449_v6 = vld [vmem:[#allocation3 + $0x558] sm:$0xff]  ;;  %v3233_v38 = vpack.c.bf16 %v1444_v35, %v1442_v12  ;;  %v1467_v37 = vld [vmem:[#allocation3 + $0x5e8] sm:$0xff] }
 0x2f5   : > { %v1208_v43 = vsel %vm451_vm1, %v3476_v40, %v3475_v2  ;;  %v1209_v44 = vsel %vm451_vm1, %v3475_v2, %v3466_v5  ;;  %v1446_v40 = vld [vmem:[#allocation3 + $0x540] sm:$0xff]  ;;  %v1448_v2 = vld [vmem:[#allocation3 + $0x550] sm:$0xff]  ;;  %v1471_v20 = vld [vmem:[#allocation3 + $0x608] sm:$0xff] }
 0x2f6   : > { %v4146_v47 = vmax.f32 %v1176_v48, %v1208_v43  ;;  %v4150_v28 = vmax.f32 %v1177_v50, %v1209_v44  ;;  %3202 = vmatpush1.bf16.msra.mxu0 %v3201_v39  ;;  %v1422_v48 = vld [vmem:[#allocation3 + $0x480] sm:$0xff]  ;;  %v1424_v50 = vld [vmem:[#allocation3 + $0x490] sm:$0xff]  ;;  %v3235_v39 = vpack.c.bf16 %v1449_v6, %v1447_v36  ;;  %v3237_v60 = vpack.c.bf16 %v1448_v2, %v1446_v40  ;;  %v1455_v44 = vld [vmem:[#allocation3 + $0x588] sm:$0xff] }
 0x2f7   : > { %3204 = vmatprep.subr.bf16.mxu0 %v3203_v0  ;;  %v3213_v7 = vpack.c.bf16 %v1424_v50, %v1422_v48  ;;  %v1451_v0 = vld [vmem:[#allocation3 + $0x568] sm:$0xff]  ;;  %v1452_v43 = vld [vmem:[#allocation3 + $0x570] sm:$0xff]  ;;  %v1458_v48 = vld [vmem:[#allocation3 + $0x5a0] sm:$0xff] }
 0x2f8   : > { %1253 = vrot.lane.b32.xlu1 %v4142_v45, %s3573_s25  ;;  %v3482_v5 = vpack.i.bf16 %v4146_v47, %v4150_v28  ;;  %v3239_v49 = vpack.c.bf16 %v1453_v41, %v1451_v0  ;;  %v1460_v50 = vld [vmem:[#allocation3 + $0x5b0] sm:$0xff]  ;;  %v1473_v21 = vld [vmem:[#allocation3 + $0x618] sm:$0xff]  ;;  %v1474_v6 = vld [vmem:[#allocation3 + $0x620] sm:$0xff] }
 0x2f9   : > { %v1477_v29 = vld [vmem:[#allocation3 + $0x638] sm:$0xff]  ;;  %v1478_v41 = vld [vmem:[#allocation3 + $0x640] sm:$0xff] }
 0x2fa   : > { %3483 = vrot.lane.b32.xlu0 %v3482_v5, %s3573_s25  ;;  %3206 = vmatpush1.bf16.msra.mxu0 %v3205_v51  ;;  %v1457_v51 = vld [vmem:[#allocation3 + $0x598] sm:$0xff]  ;;  %v1456_v5 = vld [vmem:[#allocation3 + $0x590] sm:$0xff] }
 0x2fb   : > { %3208 = vmatprep.subr.bf16.mxu0 %v3207_v53  ;;  %v3241_v53 = vpack.c.bf16 %v1452_v43, %v1450_v42  ;;  %v3243_v55 = vpack.c.bf16 %v1457_v51, %v1455_v44  ;;  %v1483_v43 = vld [vmem:[#allocation3 + $0x668] sm:$0xff]  ;;  %v1485_v44 = vld [vmem:[#allocation3 + $0x678] sm:$0xff] }
 0x2fe   : > { %3210 = vmatpush1.bf16.msra.mxu0 %v3209_v18  ;;  %v3245_v18 = vpack.c.bf16 %v1456_v5, %v1454_v31  ;;  %v1484_v31 = vld [vmem:[#allocation3 + $0x670] sm:$0xff]  ;;  %v1487_v5 = vld [vmem:[#allocation3 + $0x688] sm:$0xff] }
 0x2ff   : > { %3212 = vmatprep.subr.bf16.mxu0 %v3211_v57  ;;  %v3247_v57 = vpack.c.bf16 %v1461_v14, %v1459_v9  ;;  %v1489_v9 = vld [vmem:[#allocation3 + $0x698] sm:$0xff]  ;;  %v1486_v14 = vld [vmem:[#allocation3 + $0x680] sm:$0xff] }
 0x302   : > { %3214 = vmatpush1.bf16.msra.mxu0 %v3213_v7  ;;  %v3249_v7 = vpack.c.bf16 %v1460_v50, %v1458_v48 }
 0x303   : > { %3216 = vmatprep.subr.bf16.mxu0 %v3215_v8  ;;  %v3251_v8 = vpack.c.bf16 %v1465_v4, %v1463_v62  ;;  %v1490_v62 = vld [vmem:[#allocation3 + $0x6a0] sm:$0xff]  ;;  %v1492_v4 = vld [vmem:[#allocation3 + $0x6b0] sm:$0xff] }
 0x306   : > { %3218 = vmatpush1.bf16.msra.mxu0 %v3217_v17  ;;  %v3253_v17 = vpack.c.bf16 %v1464_v61, %v1462_v54  ;;  %v3281_v54 = vpack.c.bf16 %v1492_v4, %v1490_v62 }
 0x307   : > { %3220 = vmatprep.subr.bf16.mxu0 %v3219_v63  ;;  %v3255_v63 = vpack.c.bf16 %v1469_v16, %v1467_v37  ;;  %v1494_v37 = vld [vmem:[#allocation3 + $0x6c0] sm:$0xff]  ;;  %v1496_v16 = vld [vmem:[#allocation3 + $0x6d0] sm:$0xff] }
 0x30a   : > { %3222 = vmatpush1.bf16.msra.mxu0 %v3221_v59  ;;  %v3257_v59 = vpack.c.bf16 %v1468_v56, %v1466_v19  ;;  %v3285_v19 = vpack.c.bf16 %v1496_v16, %v1494_v37 }
 0x30b   : > { %3224 = vmatprep.subr.bf16.mxu0 %v3223_v23  ;;  %v3259_v23 = vpack.c.bf16 %v1473_v21, %v1471_v20  ;;  %v1498_v20 = vld [vmem:[#allocation3 + $0x6e0] sm:$0xff]  ;;  %v1500_v21 = vld [vmem:[#allocation3 + $0x6f0] sm:$0xff] }
 0x30e   : > { %3226 = vmatpush1.bf16.msra.mxu0 %v3225_v26  ;;  %v1472_v26 = vld [vmem:[#allocation3 + $0x610] sm:$0xff] }
 0x30f   : > { %3228 = vmatprep.subr.bf16.mxu0 %v3227_v27  ;;  %v1475_v27 = vld [vmem:[#allocation3 + $0x628] sm:$0xff]  ;;  %v3261_v12 = vpack.c.bf16 %v1472_v26, %v1470_v3  ;;  %v1502_v26 = vld [vmem:[#allocation3 + $0x700] sm:$0xff] }
 0x310   : > { %v3263_v36 = vpack.c.bf16 %v1477_v29, %v1475_v27  ;;  %v1504_v27 = vld [vmem:[#allocation3 + $0x710] sm:$0xff]  ;;  %v1507_v29 = vld [vmem:[#allocation3 + $0x728] sm:$0xff] }
 0x312   : > { %3230 = vmatpush1.bf16.msra.mxu0 %v3229_v33 }
 0x313   : > { %3232 = vmatprep.subr.bf16.mxu0 %v3231_v34 }
 0x316   : > { %3234 = vmatpush1.bf16.msra.mxu0 %v3233_v38  ;;  %v1479_v38 = vld [vmem:[#allocation3 + $0x648] sm:$0xff] }
 0x317   : > { %3236 = vmatprep.subr.bf16.mxu0 %v3235_v39  ;;  %v1481_v39 = vld [vmem:[#allocation3 + $0x658] sm:$0xff] }
 0x318   : > { %v3267_v0 = vpack.c.bf16 %v1481_v39, %v1479_v38 }
 0x31a   : > { %3238 = vmatpush1.bf16.msra.mxu0 %v3237_v60  ;;  %v1480_v60 = vld [vmem:[#allocation3 + $0x650] sm:$0xff] }
 0x31b   : > { %3240 = vmatprep.subr.bf16.mxu0 %v3239_v49  ;;  %v3269_v51 = vpack.c.bf16 %v1480_v60, %v1478_v41 }
 0x31e   : > { %3242 = vmatpush1.bf16.msra.mxu0 %v3241_v53  ;;  %v3271_v53 = vpack.c.bf16 %v1485_v44, %v1483_v43 }
 0x31f   : > { %3244 = vmatprep.subr.bf16.mxu0 %v3243_v55  ;;  %v1482_v55 = vld [vmem:[#allocation3 + $0x660] sm:$0xff] }
 0x322   : > { %3246 = vmatpush1.bf16.msra.mxu0 %v3245_v18  ;;  %v1491_v18 = vld [vmem:[#allocation3 + $0x6a8] sm:$0xff] }
 0x323   : > { %3248 = vmatprep.subr.bf16.mxu0 %v3247_v57  ;;  %v1493_v57 = vld [vmem:[#allocation3 + $0x6b8] sm:$0xff] }
 0x324   : > { %v3279_v50 = vpack.c.bf16 %v1493_v57, %v1491_v18 }
 0x326   : > { %3250 = vmatpush1.bf16.msra.mxu0 %v3249_v7  ;;  %v1495_v7 = vld [vmem:[#allocation3 + $0x6c8] sm:$0xff] }
 0x327   : > { %3252 = vmatprep.subr.bf16.mxu0 %v3251_v8  ;;  %v1497_v8 = vld [vmem:[#allocation3 + $0x6d8] sm:$0xff] }
 0x328   : > { %v3283_v61 = vpack.c.bf16 %v1497_v8, %v1495_v7 }
 0x32a   : > { %3254 = vmatpush1.bf16.msra.mxu0 %v3253_v17  ;;  %v1499_v17 = vld [vmem:[#allocation3 + $0x6e8] sm:$0xff] }
 0x32b   : > { %3256 = vmatprep.subr.bf16.mxu0 %v3255_v63  ;;  %v1501_v63 = vld [vmem:[#allocation3 + $0x6f8] sm:$0xff] }
 0x32c   : > { %v3287_v56 = vpack.c.bf16 %v1501_v63, %v1499_v17 }
 0x32e   : > { %3258 = vmatpush1.bf16.msra.mxu0 %v3257_v59  ;;  %v1503_v59 = vld [vmem:[#allocation3 + $0x708] sm:$0xff] }
 0x32f   : > { %3260 = vmatprep.subr.bf16.mxu0 %v3259_v23  ;;  %v1505_v23 = vld [vmem:[#allocation3 + $0x718] sm:$0xff] }
 0x330   : > { %v3291_v3 = vpack.c.bf16 %v1505_v23, %v1503_v59 }
 0x366   : > { %v4157_v24 = vpop.permute.xlu1 %3478 }
 0x367   : > { %v3481_v25 = vunpack.i.h.bf16 %v4157_v24  ;;  %v3480_v15 = vunpack.i.l.bf16 %v4157_v24 }
 0x369   : > { %v1259_v32 = vsel %vm558_vm3, %v3471_v1, %v3480_v15  ;;  %v1260_v22 = vsel %vm558_vm3, %v3480_v15, %v3481_v25  ;;  %v3289_v15 = vpack.c.bf16 %v1500_v21, %v1498_v20 }
 0x36a   : > { %v1274_v30 = vmax.f32 %v4074_v13, %v1259_v32  ;;  %v4168_v33 = vpop.permute.xlu1 %1253  ;;  %v1275_v34 = vmax.f32 %v4127_v10, %v1260_v22  ;;  %v3265_v13 = vpack.c.bf16 %v1476_v52, %v1474_v6  ;;  %v1509_v32 = vld [vmem:[#allocation3 + $0x738] sm:$0x1f]  ;;  %v3293_v22 = vpack.c.bf16 %v1504_v27, %v1502_v26 }
 0x36b   : > { %v1277_v35 = vmax.f32 %v4142_v45, %v4168_v33  ;;  %v1261_v6 = vsel %vm558_vm3, %v3481_v25, %v4168_v33 }
 0x36c   : > { %1727 = vmatprep.mubr.f32.mxu0 %v1275_v34  ;;  %v3484_v1 = vpop.permute.xlu0 %3483  ;;  %v1506_v34 = vld [vmem:[#allocation3 + $0x720] sm:$0xff]  ;;  %v1276_v52 = vmax.f32 %v4131_v11, %v1261_v6 }
 0x36d   : > { %v3486_v40 = vunpack.i.h.bf16 %v3484_v1  ;;  %v3485_v2 = vunpack.i.l.bf16 %v3484_v1  ;;  %1728 = vmatmul.mubr.f32.vlgmr.msra.gmra.mrb[4].mxu0 %v1274_v30  ;;  %v3295_v30 = vpack.c.bf16 %v1509_v32, %v1507_v29 }
 0x36e   : > { %3262 = vmatpush1.bf16.msra.mxu0 %v3261_v12  ;;  %2909 = vmatprep.mubr.msk.f32.mxu0 %vm1510_vm0, %v1277_v35  ;;  %v1508_v12 = vld [vmem:[#allocation3 + $0x730] sm:$0x1f]  ;;  %vm1867_vm0 = vcmask 524288   ;;  %v2084_v35 = vld [vmem:[%s4472_s6] sm:$0xff] }
 0x36f   : > { %v1255_v10 = vsel %vm558_vm3, %v3486_v40, %v3485_v2  ;;  %3264 = vmatprep.subr.bf16.mxu0 %v3263_v36  ;;  %v1256_v45 = vsel %vm558_vm3, %v3485_v2, %v4108_v58  ;;  %v3273_v58 = vpack.c.bf16 %v1484_v31, %v1482_v55  ;;  %v3298_v36 = vpack.c.bf16 %v1508_v12, %v1506_v34  ;;  %v1935_v55 = vld [vmem:[%s4471_s5 + $0x8] sm:$0x3] }
 0x370   : > { %v1270_v49 = vmax.f32 %v4146_v47, %v1255_v10  ;;  %v1271_v42 = vmax.f32 %v4150_v28, %v1256_v45  ;;  %v3275_v47 = vpack.c.bf16 %v1489_v9, %v1487_v5  ;;  %v1488_v28 = vld [vmem:[#allocation3 + $0x690] sm:$0xff] }
 0x371   : > { %v3277_v48 = vpack.c.bf16 %v1488_v28, %v1486_v14 }
 0x372   : > { %3266 = vmatpush1.bf16.msra.mxu0 %v3265_v13  ;;  %1585 = vmatprep.mubr.f32.mxu1 %v1271_v42 }
 0x373   : > { %1586 = vmatmul.mubr.f32.vlgmr.msra.gmra.mrb[4].mxu1 %v1270_v49  ;;  %3268 = vmatprep.subr.bf16.mxu0 %v3267_v0 }
 0x374   : > { %2023 = vmatprep.mubr.f32.mxu1 %v3578_v46 }
 0x376   : > { %3270 = vmatpush1.bf16.msra.mxu0 %v3269_v51 }
 0x377   : > { %3272 = vmatprep.subr.bf16.mxu0 %v3271_v53  ;;  %v1934_v53 = vld [vmem:[%s4471_s5] sm:$0xff] }
 0x37a   : > { %3274 = vmatpush1.bf16.msra.mxu0 %v3273_v58 }
 0x37b   : > { %3276 = vmatprep.subr.bf16.mxu0 %v3275_v47 }
 0x37e   : > { %3278 = vmatpush1.bf16.msra.mxu0 %v3277_v48 }
 0x37f   : > { %3280 = vmatprep.subr.bf16.mxu0 %v3279_v50 }
 0x382   : > { %3282 = vmatpush1.bf16.msra.mxu0 %v3281_v54 }
 0x383   : > { %3284 = vmatprep.subr.bf16.mxu0 %v3283_v61 }
 0x386   : > { %3286 = vmatpush1.bf16.msra.mxu0 %v3285_v19 }
 0x387   : > { %3288 = vmatprep.subr.bf16.mxu0 %v3287_v56 }
 0x38a   : > { %3290 = vmatpush1.bf16.msra.mxu0 %v3289_v15 }
 0x38b   : > { %3292 = vmatprep.subr.bf16.mxu0 %v3291_v3 }
 0x38e   : > { %3294 = vmatpush1.bf16.msra.mxu0 %v3293_v22 }
 0x38f   : > { %3297 = vmatprep.subr.msk.bf16.mxu0 %vm4180_vm7, %v3295_v30 }
 0x392   : > { %3300 = vmatpush1.bf16.msk.msra.mxu0 %vm4180_vm7, %v3298_v36 }
 0x395   : > { %1799 = vmatmul.mubr.f32.vlgmr.msra.gmra.mrb[4].mxu0 %v1276_v52 }
 0x446   : > { %v1587_v1 = vpop.f32.mrb[4].mxu1 }
 0x447   : > { %v1589_v38 = vpop.f32.mrb[5].mxu1 }
 0x468   : > { %v1800_v39 = vpop.f32.mrb[4].mxu0 }
 0x469   : > { %v3398_v40 = vadd.f32 %v1800_v39, %v1587_v1  ;;  %v1802_v2 = vpop.f32.mrb[5].mxu0  ;;  %v1932_v39 = vld [vmem:[%s4470_s4] sm:$0xff] }
 0x46a   : > { %v3399_v13 = vadd.f32 %v1802_v2, %v1589_v38 }
 0x46b   : > { %1805 = vst [vmem:[#allocation2] sm:$0x1f] %v3398_v40  ;;  %v1810_v10 = vrot.slane %v3398_v40, 3  ;;  %v1825_v24 = vrot.slane %v3398_v40, 6  ;;  %v1837_v11 = vrot.slane %v3398_v40, 1  ;;  %v1853_v0 = vrot.slane %v3398_v40, 4 }
 0x46c   : > { %v1811_v45 = vrot.slane %v3399_v13, 3  ;;  %1807 = vst.msk [vmem:[#allocation2 + $0x8] sm:$0x1f] %vm1806_vm8, %v3399_v13  ;;  %v1826_v25 = vrot.slane %v3399_v13, 6  ;;  %v1838_v33 = vrot.slane %v3399_v13, 1  ;;  %v1854_v41 = vrot.slane %v3399_v13, 4 }
 0x46d   : > { %1812 = vrot.lane.b32.xlu0 %v1810_v10, %s3572_s24  ;;  %v1869_v60 = vrot.slane %v3398_v40, 7  ;;  %v1870_v49 = vrot.slane %v3399_v13, 7  ;;  %v1882_v42 = vrot.slane %v3398_v40, 2  ;;  %v1883_v43 = vrot.slane %v3399_v13, 2  ;;  %v2085_v10 = vld [vmem:[%s4472_s6 + $0x8] sm:$0xff] }
 0x46e   : > { %1814 = vrot.lane.b32.xlu1 %v1811_v45, %s3572_s24  ;;  %v1898_v44 = vrot.slane %v3398_v40, 5  ;;  %v1899_v51 = vrot.slane %v3399_v13, 5  ;;  %v2086_v45 = vld [vmem:[%s4472_s6 + $0x10] sm:$0xff] }
 0x471   : > { %1827 = vrot.lane.b32.xlu0 %v1825_v24, %s3571_s23 }
 0x472   : > { %1829 = vrot.lane.b32.xlu1 %v1826_v25, %s3571_s23 }
 0x475   : > { %1839 = vrot.lane.b32.xlu0 %v1837_v11, %s3581_s15  ;;  %v3586_v11 = vmov 0.0|0.0  }
 0x476   : > { %1841 = vrot.lane.b32.xlu1 %v1838_v33, %s3581_s15  ;;  %v3316_v33 = vpack.c.bf16 %v2085_v10, %v2084_v35 }
 0x479   : > { %1855 = vrot.lane.b32.xlu0 %v1853_v0, %s3582_s16  ;;  %v2087_v0 = vld [vmem:[%s4472_s6 + $0x18] sm:$0xff] }
 0x47a   : > { %1857 = vrot.lane.b32.xlu1 %v1854_v41, %s3582_s16 }
 0x47d   : > { %1871 = vrot.lane.b32.xlu0 %v1869_v60, %s3583_s19 }
 0x47e   : > { %1873 = vrot.lane.b32.xlu1 %v1870_v49, %s3583_s19 }
 0x481   : > { %1884 = vrot.lane.b32.xlu0 %v1882_v42, %s3584_s22  ;;  %v3319_v42 = vpack.c.bf16 %v2087_v0, %v2086_v45 }
 0x482   : > { %1886 = vrot.lane.b32.xlu1 %v1883_v43, %s3584_s22  ;;  %s3588_s22 = smov 122  }
 0x485   : > { %1900 = vrot.lane.b32.xlu0 %v1898_v44, %s3585_s20 }
 0x486   : > { %1902 = vrot.lane.b32.xlu1 %v1899_v51, %s3585_s20  ;;  %v2088_v51 = vld [vmem:[%s4472_s6 + $0x20] sm:$0xff]  ;;  %s3589_s20 = smov 120  }
 0x489   : > { %1911 = vrot.lane.b32.xlu0 %v3398_v40, %s3573_s25  ;;  %v1933_v40 = vld [vmem:[%s4470_s4 + $0x8] sm:$0x3] }
 0x48a   : > { %1913 = vrot.lane.b32.xlu1 %v3399_v13, %s3573_s25 }
 0x48d   : > { %1938 = vperm.xlu0 %3456, %v1934_v53   ;;  %v2089_v53 = vld [vmem:[%s4472_s6 + $0x28] sm:$0xff] }
 0x48e   : > { %1943 = vperm.xlu1 %3487, %v1935_v55  }
 0x4df   : > { %v1813_v31 = vpop.permute.xlu0 %1812 }
 0x4e0   : > { %v1815_v5 = vpop.permute.xlu1 %1814 }
 0x4e1   : > { %v1816_v9 = vsel %vm451_vm1, %v1813_v31, %v1815_v5  ;;  %1821 = vst.msk [vmem:[#allocation2 + $0x8] sm:$0xe0] %vm1820_vm10, %v1815_v5  ;;  %vm1888_vm10 = vcmask 801792  }
 0x4e2   : > { %1824 = vst.msk [vmem:[#allocation2 + $0x48] sm:$0x3] %vm1823_vm11, %v1815_v5  ;;  %1819 = vst [vmem:[#allocation2 + $0x40] ss:$-60 sps:$4 sm:$0xe3] %v1816_v9   ;;  %vm1893_vm11 = vcmask 531462  }
 0x4e3   : > { %v1828_v58 = vpop.permute.xlu0 %1827 }
 0x4e4   : > { %v1830_v47 = vpop.permute.xlu1 %1829 }
 0x4e5   : > { %v1831_v14 = vsel %vm500_vm4, %v1828_v58, %v1830_v47  ;;  %1836 = vst.msk [vmem:[#allocation2 + $0x48] sm:$0x7c] %vm1835_vm12, %v1830_v47  ;;  %vm1875_vm4 = vcmask 908288   ;;  %vm1896_vm12 = vcmask 526336   ;;  %v3322_v58 = vpack.c.bf16 %v2089_v53, %v2088_v51 }
 0x4e6   : > { %1834 = vst [vmem:[#allocation2 + $0x40] sm:$0x7c] %v1831_v14  ;;  %v2090_v14 = vld [vmem:[%s4472_s6 + $0x30] sm:$0xff] }
 0x4e7   : > { %v1840_v28 = vpop.permute.xlu0 %1839 }
 0x4e8   : > { %v1842_v18 = vpop.permute.xlu1 %1841  ;;  %v1921_v8 = vld [vmem:[#allocation2 + $0x8] sm:$0xff] }
 0x4e9   : > { %v1844_v57 = vsel %vm1843_vm9, %v1840_v28, %v1842_v18  ;;  %1849 = vst.msk [vmem:[#allocation2 + $0x48] sm:$0x80] %vm1848_vm13, %v1842_v18  ;;  %v1920_v16 = vld [vmem:[#allocation2] sm:$0xff]  ;;  %vm1904_vm13 = vcmask 793600   ;;  %v2091_v28 = vld [vmem:[%s4472_s6 + $0x38] sm:$0xff] }
 0x4ea   : > { %1852 = vst.msk [vmem:[#allocation2 + $0x88] sm:$0xf] %vm1851_vm14, %v1842_v18  ;;  %1847 = vst [vmem:[#allocation2 + $0x80] ss:$-60 sps:$4 sm:$0x8f] %v1844_v57   ;;  %vm1909_vm14 = vcmask 531459   ;;  %v3325_v18 = vpack.c.bf16 %v2091_v28, %v2090_v14 }
 0x4eb   : > { %v1856_v48 = vpop.permute.xlu0 %1855  ;;  %v2092_v57 = vld [vmem:[%s4472_s6 + $0x40] sm:$0xff] }
 0x4ec   : > { %v1858_v50 = vpop.permute.xlu1 %1857 }
 0x4ed   : > { %v1860_v62 = vsel %vm1859_vm15, %v1856_v48, %v1858_v50  ;;  %1865 = vst.msk [vmem:[#allocation2 + $0x88] sm:$0xf0] %vm1864_vm2, %v1858_v50  ;;  %v2093_v48 = vld [vmem:[%s4472_s6 + $0x48] sm:$0xff]  ;;  %vm2195_vm15 = vcmask 173056   ;;  %vm2199_vm2 = vcmask 1041408  }
 0x4ee   : > { %1868 = vst.msk [vmem:[#allocation2 + $0xc8] sm:$0x1] %vm1867_vm0, %v1858_v50  ;;  %1863 = vst [vmem:[#allocation2 + $0xc0] ss:$-60 sps:$4 sm:$0xf1] %v1860_v62   ;;  %v3328_v50 = vpack.c.bf16 %v2093_v48, %v2092_v57  ;;  %v2094_v62 = vld [vmem:[%s4472_s6 + $0x50] sm:$0xff] }
 0x4ef   : > { %v1872_v4 = vpop.permute.xlu0 %1871  ;;  %vm2213_vm0 = vcmask 1043456  }
 0x4f0   : > { %v1874_v7 = vpop.permute.xlu1 %1873  ;;  %v1923_v54 = vld [vmem:[#allocation2 + $0x48] sm:$0xff] }
 0x4f1   : > { %v1876_v61 = vsel %vm1875_vm4, %v1872_v4, %v1874_v7  ;;  %1881 = vst.msk [vmem:[#allocation2 + $0xc8] sm:$0x3e] %vm1880_vm5, %v1874_v7  ;;  %v3301_v37 = vpack.c.bf16 %v1923_v54, %v1921_v8  ;;  %v1922_v17 = vld [vmem:[#allocation2 + $0x40] sm:$0xff]  ;;  %v2095_v4 = vld [vmem:[%s4472_s6 + $0x58] sm:$0xff]  ;;  %v2097_v54 = vld [vmem:[%s4472_s6 + $0x68] sm:$0xff]  ;;  %vm2227_vm4 = vcmask 1045504  }
 0x4f2   : > { %1879 = vst [vmem:[#allocation2 + $0xc0] sm:$0x3e] %v1876_v61  ;;  %v3303_v63 = vpack.c.bf16 %v1922_v17, %v1920_v16  ;;  %v3331_v7 = vpack.c.bf16 %v2095_v4, %v2094_v62  ;;  %v2096_v8 = vld [vmem:[%s4472_s6 + $0x60] sm:$0xff]  ;;  %v2099_v16 = vld [vmem:[%s4472_s6 + $0x78] sm:$0xff]  ;;  %vm2209_vm5 = vcmask 179202  }
 0x4f3   : > { %v1885_v19 = vpop.permute.xlu0 %1884  ;;  %3302 = vmatprep.subr.bf16.mxu1 %v3301_v37  ;;  %v3334_v61 = vpack.c.bf16 %v2097_v54, %v2096_v8  ;;  %v2098_v37 = vld [vmem:[%s4472_s6 + $0x70] sm:$0xff] }
 0x4f4   : > { %v1887_v56 = vpop.permute.xlu1 %1886  ;;  %3304 = vmatpush1.bf16.msra.mxu1 %v3303_v63  ;;  %v1925_v26 = vld [vmem:[#allocation2 + $0x88] sm:$0xff]  ;;  %v3337_v17 = vpack.c.bf16 %v2099_v16, %v2098_v37  ;;  %v2100_v63 = vld [vmem:[%s4472_s6 + $0x80] sm:$0xff] }
 0x4f5   : > { %v1889_v20 = vsel %vm1888_vm10, %v1885_v19, %v1887_v56  ;;  %1894 = vst.msk [vmem:[#allocation2 + $0xc8] sm:$0xc0] %vm1893_vm11, %v1887_v56  ;;  %v1924_v22 = vld [vmem:[#allocation2 + $0x80] sm:$0xff]  ;;  %v2101_v19 = vld [vmem:[%s4472_s6 + $0x88] sm:$0xff]  ;;  %vm2211_vm10 = vcmask 175104   ;;  %vm2223_vm11 = vcmask 179204  }
 0x4f6   : > { %1897 = vst.msk [vmem:[#allocation2 + $0x108] sm:$0x7] %vm1896_vm12, %v1887_v56  ;;  %1892 = vst [vmem:[#allocation2 + $0x100] ss:$-60 sps:$4 sm:$0xc7] %v1889_v20   ;;  %v3340_v56 = vpack.c.bf16 %v2101_v19, %v2100_v63  ;;  %v2102_v20 = vld [vmem:[%s4472_s6 + $0x90] sm:$0xff] }
 0x4f7   : > { %v1901_v21 = vpop.permute.xlu0 %1900  ;;  %vm2225_vm12 = vcmask 177152  }
 0x4f8   : > { %v1903_v59 = vpop.permute.xlu1 %1902 }
 0x4f9   : > { %v1905_v23 = vsel %vm1904_vm13, %v1901_v21, %v1903_v59  ;;  %1910 = vst.msk [vmem:[#allocation2 + $0x108] sm:$0xf8] %vm1909_vm14, %v1903_v59  ;;  %v2103_v21 = vld [vmem:[%s4472_s6 + $0x98] sm:$0xff]  ;;  %vm2237_vm13 = vcmask 179206   ;;  %vm4382_vm14 = vmpackc.low %vm2199_vm2, %vm4489_vm6  ;;  %vm2417_vm6 = vcmask 80896  }
 0x4fa   : > { %1908 = vst [vmem:[#allocation2 + $0x100] sm:$0xf8] %v1905_v23  ;;  %v3343_v59 = vpack.c.bf16 %v2103_v21, %v2102_v20  ;;  %v2104_v23 = vld [vmem:[%s4472_s6 + $0xa0] sm:$0xff] }
 0x4fb   : > { %v1912_v15 = vpop.permute.xlu0 %1911 }
 0x4fc   : > { %v1914_v3 = vpop.permute.xlu1 %1913  ;;  %v1927_v27 = vld [vmem:[#allocation2 + $0xc8] sm:$0xff] }
 0x4fd   : > { %v1915_v29 = vsel %vm558_vm3, %v1912_v15, %v1914_v3  ;;  %1919 = vst.msk [vmem:[#allocation2 + $0x148] sm:$0x1f] %vm1806_vm8, %v1914_v3  ;;  %v3305_v32 = vpack.c.bf16 %v1927_v27, %v1925_v26  ;;  %v1926_v30 = vld [vmem:[#allocation2 + $0xc0] sm:$0xff]  ;;  %vm1946_vm3 = vcmask 367616   ;;  %v2105_v15 = vld [vmem:[%s4472_s6 + $0xa8] sm:$0xff]  ;;  %vm2107_vm8 = vcmask 400384  }
 0x4fe   : > { %1918 = vst [vmem:[#allocation2 + $0x140] sm:$0x1f] %v1915_v29  ;;  %v3307_v34 = vpack.c.bf16 %v1926_v30, %v1924_v22  ;;  %v3346_v3 = vpack.c.bf16 %v2105_v15, %v2104_v23  ;;  %v2106_v26 = vld [vmem:[%s4472_s6 + $0xb0] sm:$0x1] }
 0x4ff   : > { %3306 = vmatprep.subr.bf16.mxu1 %v3305_v32 }
 0x500   : > { %3308 = vmatpush1.bf16.msra.mxu1 %v3307_v34  ;;  %v1929_v12 = vld [vmem:[#allocation2 + $0x108] sm:$0xff] }
 0x501   : > { %v1928_v52 = vld [vmem:[#allocation2 + $0x100] sm:$0xff] }
 0x504   : > { %v1931_v36 = vld [vmem:[#allocation2 + $0x148] sm:$0x1f] }
 0x505   : > { %v3309_v6 = vpack.c.bf16 %v1931_v36, %v1929_v12  ;;  %v1930_v1 = vld [vmem:[#allocation2 + $0x140] sm:$0x1f] }
 0x506   : > { %v3312_v38 = vpack.c.bf16 %v1930_v1, %v1928_v52 }
 0x507   : > { %3311 = vmatprep.subr.msk.bf16.mxu1 %vm4180_vm7, %v3309_v6 }
 0x508   : > { %3314 = vmatpush1.bf16.msk.msra.mxu1 %vm4180_vm7, %v3312_v38  ;;  %vm2114_vm7 = vcmask 1040384  }
 0x509   : > { %3315 = vmatprep.subr.bf16.mxu1 %v3586_v11 }
 0x50b   : > { %2912 = vmatmul.mubr.msk.f32.vlgmr.msra.gmra.mrb[6].mxu1 %vm1946_vm3, %v1932_v39 }
 0x50c   : > { %2029 = vmatprep.mubr.f32.mxu1 %v3578_v46  ;;  %v1939_v2 = vpop.permute.xlu0 %1938  ;;  %3317 = vmatpush1.bf16.msra.mxu1 %v3316_v33 }
 0x50d   : > { %v1944_v60 = vpop.permute.xlu1 %1943  ;;  %3318 = vmatprep.subr.bf16.mxu1 %v3586_v11 }
 0x50f   : > { %2913 = vmatmul.mubr.msk.f32.gmra.mrb[8].mxu1 %vm1946_vm3, %v1933_v40  ;;  %vm2786_vm3 = vcmask 1024  }
 0x510   : > { %3320 = vmatpush1.bf16.msra.mxu1 %v3319_v42 }
 0x511   : > { %3321 = vmatprep.subr.bf16.mxu1 %v3586_v11 }
 0x514   : > { %3323 = vmatpush1.bf16.msra.mxu1 %v3322_v58 }
 0x515   : > { %3324 = vmatprep.subr.bf16.mxu1 %v3586_v11 }
 0x518   : > { %3326 = vmatpush1.bf16.msra.mxu1 %v3325_v18 }
 0x519   : > { %3327 = vmatprep.subr.bf16.mxu1 %v3586_v11 }
 0x51c   : > { %3329 = vmatpush1.bf16.msra.mxu1 %v3328_v50 }
 0x51d   : > { %3330 = vmatprep.subr.bf16.mxu1 %v3586_v11 }
 0x520   : > { %3332 = vmatpush1.bf16.msra.mxu1 %v3331_v7 }
 0x521   : > { %3333 = vmatprep.subr.bf16.mxu1 %v3586_v11 }
 0x524   : > { %3335 = vmatpush1.bf16.msra.mxu1 %v3334_v61 }
 0x525   : > { %3336 = vmatprep.subr.bf16.mxu1 %v3586_v11 }
 0x528   : > { %3338 = vmatpush1.bf16.msra.mxu1 %v3337_v17 }
 0x529   : > { %3339 = vmatprep.subr.bf16.mxu1 %v3586_v11 }
 0x52c   : > { %3341 = vmatpush1.bf16.msra.mxu1 %v3340_v56 }
 0x52d   : > { %3342 = vmatprep.subr.bf16.mxu1 %v3586_v11 }
 0x530   : > { %3344 = vmatpush1.bf16.msra.mxu1 %v3343_v59 }
 0x531   : > { %3345 = vmatprep.subr.bf16.mxu1 %v3586_v11 }
 0x534   : > { %3347 = vmatpush1.bf16.msra.mxu1 %v3346_v3 }
 0x535   : > { %2162 = vmatprep.subr.mxu1 %v3578_v46 }
 0x538   : > { %2914 = vmatpush1.msk.msra.mxu1 %vm2114_vm7, %v2106_v26  ;;  %vm2784_vm7 = vcmask 7168  }
 0x5de   : > { %v2025_v13 = vpop.f32.mrb[6].mxu1 }
 0x5df   : > { %v4233_v24 = vadd.f32 %v2025_v13, %v1939_v2  ;;  %v2027_v25 = vpop.f32.mrb[7].mxu1 }
 0x5e0   : > { %v4239_v41 = vadd.f32 %v2027_v25, %v1939_v2 }
 0x5e1   : > { %v2036_v49 = vmax.f32 %v4233_v24, 0.0 }
 0x5e2   : > { %v2037_v43 = vmax.f32 %v4239_v41, 0.0  ;;  %v2031_v44 = vpop.f32.mrb[8].mxu1 }
 0x5e3   : > { %v4250_v55 = vadd.f32 %v2031_v44, %v1944_v60  ;;  %v2033_v31 = vpop.f32.mrb[9].mxu1  ;;  %2044 = vrot.lane.b32.xlu0 %v2036_v49, %s3572_s24 }
 0x5e4   : > { %v4255_v5 = vadd.f32 %v2033_v31, %v1944_v60  ;;  %2046 = vrot.lane.b32.xlu1 %v2037_v43, %s3572_s24  ;;  %v2292_v31 = vld [vmem:[%s4473_s7] sm:$0xff] }
 0x5e5   : > { %v2038_v9 = vmax.f32 %v4250_v55, 0.0  ;;  %v2294_v55 = vld [vmem:[%s4474_s8] sm:$0xff] }
 0x5e6   : > { %v2039_v47 = vmax.f32 %v4255_v5, 0.0  ;;  %v2295_v5 = vld [vmem:[%s4474_s8 + $0x8] sm:$0x3] }
 0x5e7   : > { %2048 = vrot.lane.b32.xlu0 %v2038_v9, %s3572_s24 }
 0x5e8   : > { %2050 = vrot.lane.b32.xlu1 %v2039_v47, %s3572_s24 }
 0x655   : > { %v2045_v27 = vpop.permute.xlu0 %2044 }
 0x656   : > { %v2047_v29 = vpop.permute.xlu1 %2046 }
 0x657   : > { %v2052_v32 = vsel %vm451_vm1, %v2045_v27, %v2047_v29  ;;  %v2059_v22 = vmax.f32 %v2037_v43, %v2047_v29 }
 0x658   : > { %v2058_v30 = vmax.f32 %v2036_v49, %v2052_v32 }
 0x659   : > { %2068 = vrot.lane.b32.xlu1 %v2059_v22, %s3581_s15  ;;  %v2049_v34 = vpop.permute.xlu0 %2048 }
 0x65a   : > { %v2051_v46 = vpop.permute.xlu1 %2050  ;;  %2066 = vrot.lane.b32.xlu0 %v2058_v30, %s3581_s15 }
 0x65b   : > { %v2053_v12 = vsel %vm451_vm1, %v2049_v34, %v2051_v46  ;;  %v2061_v36 = vmax.f32 %v2039_v47, %v2051_v46  ;;  %vm2193_vm1 = vcmask 179200  }
 0x65c   : > { %v2060_v6 = vmax.f32 %v2038_v9, %v2053_v12  ;;  %v2293_v12 = vld [vmem:[%s4473_s7 + $0x8] sm:$0x3] }
 0x65d   : > { %2072 = vrot.lane.b32.xlu1 %v2061_v36, %s3581_s15 }
 0x65e   : > { %2070 = vrot.lane.b32.xlu0 %v2060_v6, %s3581_s15  ;;  %s3587_s15 = smov 121  }
 0x6cb   : > { %v2069_v52 = vpop.permute.xlu1 %2068 }
 0x6cc   : > { %v2081_v1 = vmax.f32 %v2059_v22, %v2069_v52  ;;  %v2067_v38 = vpop.permute.xlu0 %2066 }
 0x6cd   : > { %v2074_v39 = vsel %vm1843_vm9, %v2067_v38, %v2069_v52 }
 0x6ce   : > { %v2080_v40 = vmax.f32 %v2058_v30, %v2074_v39  ;;  %2915 = vmatprep.mubr.msk.f32.mxu1 %vm2107_vm8, %v2081_v1 }
 0x6cf   : > { %v2073_v2 = vpop.permute.xlu1 %2072 }
 0x6d0   : > { %v2083_v13 = vmax.f32 %v2061_v36, %v2073_v2  ;;  %2183 = vmatmul.mubr.f32.vlgmr.msra.gmra.mrb[10].mxu1 %v2080_v40  ;;  %v2071_v35 = vpop.permute.xlu0 %2070 }
 0x6d1   : > { %v2075_v10 = vsel %vm1843_vm9, %v2071_v35, %v2073_v2  ;;  %vm2306_vm9 = vcmask 736256  }
 0x6d2   : > { %v2082_v45 = vmax.f32 %v2060_v6, %v2075_v10  ;;  %2916 = vmatprep.mubr.msk.f32.mxu1 %vm2107_vm8, %v2083_v13 }
 0x6d4   : > { %2188 = vmatmul.mubr.f32.gmra.mrb[12].mxu1 %v2082_v45 }
 0x6d5   : > { %2996 = vmatprep.mubr.msk.f32.mxu1 %vm2306_vm9, %v2292_v31 }
 0x7a3   : > { %v2184_v24 = vpop.f32.mrb[10].mxu1 }
 0x7a4   : > { %2194 = vst.msk [vmem:[#allocation2] sm:$0xff] %vm2193_vm1, %v2184_v24  ;;  %2240 = vrot.lane.b32.xlu0 %v2184_v24, %s3587_s15  ;;  %v2186_v25 = vpop.f32.mrb[11].mxu1  ;;  %v2200_v11 = vrot.slane %v2184_v24, 6  ;;  %v2214_v0 = vrot.slane %v2184_v24, 4  ;;  %v2228_v49 = vrot.slane %v2184_v24, 2 }
 0x7a7   : > { %v2189_v33 = vpop.f32.mrb[12].mxu1 }
 0x7a8   : > { %2203 = vrot.lane.b32.xlu0 %v2200_v11, %s3572_s24  ;;  %2242 = vrot.lane.b32.xlu1 %v2189_v33, %s3587_s15  ;;  %v2191_v41 = vpop.f32.mrb[13].mxu1  ;;  %v2201_v60 = vrot.slane %v2189_v33, 6  ;;  %v2215_v42 = vrot.slane %v2189_v33, 4  ;;  %v2229_v43 = vrot.slane %v2189_v33, 2  ;;  %2196 = vst.msk [vmem:[#allocation2 + $0x40] sm:$0x3] %vm2195_vm15, %v2189_v33 }
 0x7aa   : > { %v2202_v44 = vsel %vm2199_vm2, %v2200_v11, %v2201_v60  ;;  %v2216_v51 = vsel %vm2213_vm0, %v2214_v0, %v2215_v42  ;;  %v2230_v53 = vsel %vm2227_vm4, %v2228_v49, %v2229_v43 }
 0x7ab   : > { %v2280_v48 = vld [vmem:[#allocation2] sm:$0xff] }
 0x7ac   : > { %2217 = vrot.lane.b32.xlu0 %v2214_v0, %s3571_s23  ;;  %2205 = vrot.lane.b32.xlu1 %v2202_v44, %s3572_s24 }
 0x7b0   : > { %2231 = vrot.lane.b32.xlu0 %v2228_v49, %s3588_s22  ;;  %2219 = vrot.lane.b32.xlu1 %v2216_v51, %s3571_s23 }
 0x7b4   : > { %2248 = vrot.lane.b32.xlu0 %v2200_v11, %s3589_s20  ;;  %2233 = vrot.lane.b32.xlu1 %v2230_v53, %s3588_s22  ;;  %v2415_v11 = vld [vmem:[%s4475_s9] sm:$0xff] }
 0x7b8   : > { %2256 = vrot.lane.b32.xlu0 %v2214_v0, %s3590_s21  ;;  %2250 = vrot.lane.b32.xlu1 %v2202_v44, %s3589_s20  ;;  %s2941_s20 = sshll.u32 %s4495_s18, 4 }
 0x7bc   : > { %2264 = vrot.lane.b32.xlu0 %v2228_v49, %s3591_s26  ;;  %2258 = vrot.lane.b32.xlu1 %v2216_v51, %s3590_s21  ;;  %v2416_v51 = vld [vmem:[%s4475_s9 + $0x8] sm:$0x3] }
 0x7c0   : > { %2272 = vrot.lane.b32.xlu0 %v2184_v24, %s3592_s27  ;;  %2266 = vrot.lane.b32.xlu1 %v2230_v53, %s3591_s26  ;;  %v2923_v53 = vld [vmem:[%s4475_s9 + $0x10] sm:$0xff] }
 0x7c4   : > { %2298 = vperm.xlu0 %3456, %v2294_v55   ;;  %2274 = vrot.lane.b32.xlu1 %v2189_v33, %s3592_s27 }
 0x7c8   : > { %2303 = vperm.xlu1 %3487, %v2295_v5  }
 0x816   : > { %v2241_v9 = vpop.permute.xlu0 %2240 }
 0x817   : > { %2246 = vst.msk [vmem:[#allocation2 + $0x140] sm:$0xff] %vm2193_vm1, %v2241_v9 }
 0x81a   : > { %v2243_v58 = vpop.permute.xlu1 %2242  ;;  %v2204_v47 = vpop.permute.xlu0 %2203 }
 0x81b   : > { %2247 = vst.msk [vmem:[#allocation2 + $0x180] sm:$0x3] %vm2195_vm15, %v2243_v58 }
 0x81c   : > { %2210 = vst.msk [vmem:[#allocation2 + $0x40] sm:$0xfc] %vm2209_vm5, %v2204_v47 }
 0x81e   : > { %v2206_v14 = vpop.permute.xlu1 %2205  ;;  %v2218_v28 = vpop.permute.xlu0 %2217  ;;  %v2285_v56 = vld [vmem:[#allocation2 + $0x140] sm:$0xff] }
 0x81f   : > { %2212 = vst.msk [vmem:[#allocation2 + $0x80] sm:$0xf] %vm2211_vm10, %v2206_v14 }
 0x820   : > { %2224 = vst.msk [vmem:[#allocation2 + $0x80] sm:$0xf0] %vm2223_vm11, %v2218_v28 }
 0x822   : > { %v2220_v18 = vpop.permute.xlu1 %2219  ;;  %v2232_v57 = vpop.permute.xlu0 %2231 }
 0x823   : > { %v2281_v50 = vld [vmem:[#allocation2 + $0x40] sm:$0xff]  ;;  %2226 = vst.msk [vmem:[#allocation2 + $0xc0] sm:$0x3f] %vm2225_vm12, %v2220_v18 }
 0x824   : > { %2238 = vst.msk [vmem:[#allocation2 + $0xc0] sm:$0xc0] %vm2237_vm13, %v2232_v57  ;;  %v3348_v62 = vpack.c.bf16 %v2281_v50, %v2280_v48  ;;  %v2924_v50 = vld [vmem:[%s4475_s9 + $0x18] sm:$0x3] }
 0x826   : > { %3349 = vmatprep.subr.bf16.mxu1 %v3348_v62  ;;  %v2234_v4 = vpop.permute.xlu1 %2233  ;;  %v2249_v7 = vpop.permute.xlu0 %2248 }
 0x827   : > { %3351 = vmatpush3.bf16.msra.mxu1 %v3348_v62  ;;  %2239 = vst.msk [vmem:[#allocation2 + $0x100] sm:$0xff] %vm2193_vm1, %v2234_v4  ;;  %v2282_v61 = vld [vmem:[#allocation2 + $0x80] sm:$0xff] }
 0x828   : > { %2254 = vst.msk [vmem:[#allocation2 + $0x180] sm:$0xfc] %vm2209_vm5, %v2249_v7  ;;  %v2928_v62 = vld [vmem:[%s4475_s9 + $0x20] sm:$0xff]  ;;  %v2929_v7 = vld [vmem:[%s4475_s9 + $0x28] sm:$0x3] }
 0x82a   : > { %v2251_v8 = vpop.permute.xlu1 %2250  ;;  %v2257_v54 = vpop.permute.xlu0 %2256 }
 0x82b   : > { %v2283_v37 = vld [vmem:[#allocation2 + $0xc0] sm:$0xff]  ;;  %2255 = vst.msk [vmem:[#allocation2 + $0x1c0] sm:$0xf] %vm2211_vm10, %v2251_v8  ;;  %v2933_v8 = vld [vmem:[%s4475_s9 + $0x30] sm:$0xff] }
 0x82c   : > { %2262 = vst.msk [vmem:[#allocation2 + $0x1c0] sm:$0xf0] %vm2223_vm11, %v2257_v54  ;;  %v3352_v16 = vpack.c.bf16 %v2283_v37, %v2282_v61  ;;  %v2934_v54 = vld [vmem:[%s4475_s9 + $0x38] sm:$0x3]  ;;  %v2414_v61 = vld [vmem:[%s4476_s10 + $0x8] sm:$0x3] }
 0x82d   : > { %v2413_v37 = vld [vmem:[%s4476_s10] sm:$0xff] }
 0x82e   : > { %3353 = vmatprep.subr.bf16.mxu1 %v3352_v16  ;;  %v2259_v17 = vpop.permute.xlu1 %2258  ;;  %v2265_v63 = vpop.permute.xlu0 %2264  ;;  %v2284_v19 = vld [vmem:[#allocation2 + $0x100] sm:$0xff] }
 0x82f   : > { %3355 = vmatpush3.bf16.msra.mxu1 %v3352_v16  ;;  %2263 = vst.msk [vmem:[#allocation2 + $0x200] sm:$0x3f] %vm2225_vm12, %v2259_v17  ;;  %v3356_v20 = vpack.c.bf16 %v2285_v56, %v2284_v19  ;;  %v2286_v23 = vld [vmem:[#allocation2 + $0x180] sm:$0xff] }
 0x830   : > { %2270 = vst.msk [vmem:[#allocation2 + $0x200] sm:$0xc0] %vm2237_vm13, %v2265_v63 }
 0x831   : > { %3357 = vmatprep.subr.bf16.mxu1 %v3356_v20 }
 0x832   : > { %v2267_v21 = vpop.permute.xlu1 %2266  ;;  %v2273_v59 = vpop.permute.xlu0 %2272 }
 0x833   : > { %3359 = vmatpush3.bf16.msra.mxu1 %v3356_v20  ;;  %v2287_v15 = vld [vmem:[#allocation2 + $0x1c0] sm:$0xff]  ;;  %2271 = vst.msk [vmem:[#allocation2 + $0x240] sm:$0xff] %vm2193_vm1, %v2267_v21  ;;  %2278 = vst.msk [vmem:[#allocation2 + $0x280] sm:$0xff] %vm2193_vm1, %v2273_v59 }
 0x834   : > { %v3360_v3 = vpack.c.bf16 %v2287_v15, %v2286_v23 }
 0x836   : > { %3361 = vmatprep.subr.bf16.mxu1 %v3360_v3  ;;  %v2275_v26 = vpop.permute.xlu1 %2274 }
 0x837   : > { %3363 = vmatpush3.bf16.msra.mxu1 %v3360_v3  ;;  %2279 = vst.msk [vmem:[#allocation2 + $0x2c0] sm:$0x3] %vm2195_vm15, %v2275_v26  ;;  %v2288_v27 = vld [vmem:[#allocation2 + $0x200] sm:$0xff] }
 0x83a   : > { %v2289_v29 = vld [vmem:[#allocation2 + $0x240] sm:$0xff] }
 0x83b   : > { %v3364_v32 = vpack.c.bf16 %v2289_v29, %v2288_v27  ;;  %v2290_v30 = vld [vmem:[#allocation2 + $0x280] sm:$0xff] }
 0x83d   : > { %3365 = vmatprep.subr.bf16.mxu1 %v3364_v32 }
 0x83e   : > { %3367 = vmatpush3.bf16.msra.mxu1 %v3364_v32  ;;  %v2291_v34 = vld [vmem:[#allocation2 + $0x2c0] sm:$0x3] }
 0x83f   : > { %v3368_v46 = vpack.c.bf16 %v2291_v34, %v2290_v30 }
 0x841   : > { %3370 = vmatprep.subr.msk.bf16.mxu1 %vm4382_vm14, %v3368_v46 }
 0x842   : > { %3373 = vmatpush3.bf16.msk.msra.mxu1 %vm4382_vm14, %v3368_v46 }
 0x843   : > { %v2299_v52 = vpop.permute.xlu0 %2298 }
 0x845   : > { %2997 = vmatmul.mubr.msk.f32.vlgmr.msra.gmra.mrb[14].mxu1 %vm2306_vm9, %v2293_v12 }
 0x846   : > { %3003 = vmatprep.mubr.msk.f32.mxu1 %vm2417_vm6, %v2415_v11 }
 0x847   : > { %v2304_v36 = vpop.permute.xlu1 %2303 }
 0x918   : > { %v2998_v6 = vpop.f32.mrb[14].mxu1 }
 0x919   : > { %v2388_v1 = vadd.f32 %v2998_v6, %v2304_v36  ;;  %v2382_v38 = vpop.f32.mrb[15].mxu1 }
 0x91a   : > { %v2383_v39 = vadd.f32 %v2382_v38, %v2299_v52 }
 0x91b   : > { %v2392_v40 = vmax.f32 %v2388_v1, 0.0 }
 0x91c   : > { %v2391_v2 = vmax.f32 %v2383_v39, 0.0 }
 0x91e   : > { %v3488_v13 = vpack.i.bf16 %v2392_v40, %v2391_v2 }
 0x920   : > { %3489 = vrot.lane.b32.xlu0 %v3488_v13, %s3572_s24 }
 0x992   : > { %v3490_v35 = vpop.permute.xlu0 %3489 }
 0x993   : > { %v3492_v10 = vunpack.i.h.bf16 %v3490_v35  ;;  %v3491_v45 = vunpack.i.l.bf16 %v3490_v35 }
 0x995   : > { %v2402_v24 = vmax.f32 %v2392_v40, %v3492_v10  ;;  %v2401_v25 = vmax.f32 %v2391_v2, %v3491_v45 }
 0x997   : > { %v3493_v33 = vpack.i.bf16 %v2402_v24, %v2401_v25 }
 0x999   : > { %3494 = vrot.lane.b32.xlu1 %v3493_v33, %s3588_s22 }
 0xa0b   : > { %v3495_v0 = vpop.permute.xlu1 %3494 }
 0xa0c   : > { %v3497_v41 = vunpack.i.h.bf16 %v3495_v0  ;;  %v3496_v60 = vunpack.i.l.bf16 %v3495_v0 }
 0xa0e   : > { %v2412_v49 = vmax.f32 %v2402_v24, %v3497_v41  ;;  %v2411_v42 = vmax.f32 %v2401_v25, %v3496_v60 }
 0xa10   : > { %v3503_v43 = vpack.i.bf16 %v2412_v49, %v2411_v42  ;;  %v3374_v44 = vpack.c.bf16 %v2412_v49, %v2411_v42 }
 0xa12   : > { %3504 = vrot.lane.b32.xlu1 %v3503_v43, %s3590_s21  ;;  %3499 = vrot.lane.b32.xlu0 %v3503_v43, %s3571_s23  ;;  %s401_s23 = scalar_lea.vmem %s4477_s11, %s2941_s20 }
 0xa13   : > { %3376 = vmatprep.subr.msk.bf16.mxu1 %vm4382_vm14, %v3374_v44 }
 0xa14   : > { %3379 = vmatpush3.bf16.msk.msra.mxu1 %vm4382_vm14, %v3374_v44 }
 0xa16   : > { %3509 = vrot.lane.b32.xlu0 %v3503_v43, %s3592_s27 }
 0xa17   : > { %3004 = vmatmul.mubr.msk.f32.vlgmr.msra.gmra.mrb[16].mxu1 %vm2417_vm6, %v2416_v51 }
 0xa18   : > { %3010 = vmatprep.mubr.msk.f32.mxu1 %vm2417_vm6, %v2923_v53 }
 0xa84   : > { %v3505_v55 = vpop.permute.xlu1 %3504  ;;  %v3500_v31 = vpop.permute.xlu0 %3499 }
 0xa85   : > { %v3507_v5 = vunpack.i.h.bf16 %v3505_v55  ;;  %v3506_v9 = vunpack.i.l.bf16 %v3505_v55  ;;  %v3502_v58 = vunpack.i.h.bf16 %v3500_v31  ;;  %v3501_v47 = vunpack.i.l.bf16 %v3500_v31 }
 0xa87   : > { %v3380_v14 = vpack.c.bf16 %v3502_v58, %v3501_v47  ;;  %v3386_v18 = vpack.c.bf16 %v3507_v5, %v3506_v9 }
 0xa88   : > { %v3510_v28 = vpop.permute.xlu0 %3509 }
 0xa89   : > { %v3512_v57 = vunpack.i.h.bf16 %v3510_v28  ;;  %v3511_v48 = vunpack.i.l.bf16 %v3510_v28  ;;  %3382 = vmatprep.subr.msk.bf16.mxu1 %vm4382_vm14, %v3380_v14 }
 0xa8a   : > { %3385 = vmatpush3.bf16.msk.msra.mxu1 %vm4382_vm14, %v3380_v14 }
 0xa8b   : > { %3388 = vmatprep.subr.msk.bf16.mxu1 %vm4382_vm14, %v3386_v18  ;;  %v3392_v4 = vpack.c.bf16 %v3512_v57, %v3511_v48 }
 0xa8d   : > { %3011 = vmatmul.mubr.msk.f32.vlgmr.msra.gmra.mrb[16].mxu1 %vm2417_vm6, %v2924_v50 }
 0xa8e   : > { %3391 = vmatpush3.bf16.msk.msra.mxu1 %vm4382_vm14, %v3386_v18  ;;  %3017 = vmatprep.mubr.msk.f32.mxu1 %vm2417_vm6, %v2928_v62 }
 0xa8f   : > { %3394 = vmatprep.subr.msk.bf16.mxu1 %vm4382_vm14, %v3392_v4 }
 0xa95   : > { %3018 = vmatmul.mubr.msk.f32.vlgmr.msra.gmra.mrb[16].mxu1 %vm2417_vm6, %v2929_v7 }
 0xa96   : > { %3397 = vmatpush3.bf16.msk.msra.mxu1 %vm4382_vm14, %v3392_v4  ;;  %3024 = vmatprep.mubr.msk.f32.mxu1 %vm2417_vm6, %v2933_v8 }
 0xa9d   : > { %3025 = vmatmul.mubr.msk.f32.vlgmr.msra.gmra.mrb[16].mxu1 %vm2417_vm6, %v2934_v54 }
 0xb70   : > { %v3026_v16 = vpop.f32.mrb[16].mxu1 }
 0xb71   : > { %v3400_v17 = vadd.f32 %v3026_v16, %v2414_v61  ;;  %v2773_v63 = vpop.f32.mrb[17].mxu1 }
 0xb72   : > { %v3401_v19 = vadd.f32 %v2773_v63, %v2413_v37 }
 0xb73   : > { %v2787_v56 = vsel %vm2786_vm3, %v3400_v17, -inf }
 0xb74   : > { %v2785_v20 = vsel %vm2784_vm7, %v3401_v19, -inf }
 0xb75   : > { %v2788_v21 = vmax.f32 %v2785_v20, %v2787_v56 }
 0xb77   : > { %v2789_v59 = vrot.slane %v2788_v21, 4 }
 0xb79   : > { %v2790_v23 = vmax.f32 %v2788_v21, %v2789_v59 }
 0xb7b   : > { %v2791_v15 = vrot.slane %v2790_v23, 2 }
 0xb7d   : > { %v2792_v3 = vmax.f32 %v2790_v23, %v2791_v15 }
 0xb7f   : > { %v2793_v26 = vrot.slane %v2792_v3, 1 }
 0xb81   : > { %v2794_v27 = vmax.f32 %v2792_v3, %v2793_v26 }
 0xb83   : > { %v2795_v29 = vsub.f32 %v3401_v19, %v2794_v27  ;;  %v2796_v32 = vsub.f32 %v3400_v17, %v2794_v27 }
 0xb85   : > { %v2797_v22 = vmul.f32 1.442695, %v2795_v29  ;;  %v2799_v30 = vmul.f32 1.442695, %v2796_v32 }
 0xb87   : > { %3521 = vpow2.f32 %v2797_v22 }
 0xb88   : > { %3523 = vpow2.f32 %v2799_v30 }
 0xb91   : > { %v3522_v34 = vpop.eup %3521 }
 0xb92   : > { %v3524_v46 = vpop.eup %3523  ;;  %v2801_v12 = vsel %vm2784_vm7, %v3522_v34, 0.0 }
 0xb93   : > { %v2802_v36 = vsel %vm2786_vm3, %v3524_v46, 0.0 }
 0xb94   : > { %v2803_v6 = vadd.f32 %v2802_v36, %v2801_v12 }
 0xb96   : > { %v2804_v52 = vrot.slane %v2803_v6, 4 }
 0xb98   : > { %v2805_v1 = vadd.f32 %v2804_v52, %v2803_v6 }
 0xb9a   : > { %v2806_v38 = vrot.slane %v2805_v1, 2 }
 0xb9c   : > { %v2807_v39 = vadd.f32 %v2806_v38, %v2805_v1 }
 0xb9e   : > { %v2808_v40 = vrot.slane %v2807_v39, 1 }
 0xba0   : > { %v2809_v2 = vadd.f32 %v2808_v40, %v2807_v39 }
 0xba2   : > { %3525 = vlog2.f32 %v2809_v2 }
 0xbac   : > { %v3526_v13 = vpop.eup %3525 }
 0xbad   : > { %v2811_v35 = vmul.f32 0.6931472, %v3526_v13 }
 0xbaf   : > { %v2812_v10 = vadd.f32 %v2811_v35, %v2794_v27 }
 0xbb1   : > { %v2813_v45 = vsub.f32 %v3401_v19, %v2812_v10  ;;  %v2814_v24 = vsub.f32 %v3400_v17, %v2812_v10 }
 0xbb3   : > { %2815 = vst.msk [vmem:[%s401_s23] sm:$0xff] %vm2784_vm7, %v2813_v45 }
 0xbb4   : > { %2816 = vst.msk [vmem:[%s401_s23 + $0x8] sm:$0x3] %vm2786_vm3, %v2814_v24 }
 0xbb5 PF: > { %s22_s17 = sadd.s32 1, %s3565_s17  }
 0xbb6   : > { %p19_p3 = scmp.ge.s32.totalorder %s22_s17, 4  }
 0xbb8   :  { %21 = sbr.rel (!%p19_p3) target bundleno = 1 (0x1), region = 102 }
 0xbbf   :  { %2838 = vsyncpa [#allocation4], 1 }
 0xbc0   :  { %2840 = vsyncpa [#allocation4 + $0x1], 1 }

</bundles_post_ra>
